<compile_context>
chip_gen: v7x
topology: tpu7x:2x2x1
jax: 0.10.0
libtpu: 0.0.40
codegen_flags: <defaults>
</compile_context>

<pallas_src>
import functools

import numpy as np

import jax
import jax.numpy as jnp
from jax.experimental import pallas as pl
from jax.experimental.pallas import tpu as pltpu


def _round_up(x, m):
    return ((x + m - 1) // m) * m


# ----------------------------------------------------------------------------
# Pallas kernel 1: fused HONet MLP backbone
#   out = relu(x @ W1 + bbox @ W1b + b1) @ W2 + b2
# bf16 MXU operands, f32 accumulation, grid = (rows, K-tiles).
# ----------------------------------------------------------------------------
def _honet_mlp_kernel(x_ref, bb_ref, w1_ref, w1b_ref, b1_ref, w2_ref, b2_ref,
                      o_ref, acc_ref):
    k = pl.program_id(1)

    @pl.when(k == 0)
    def _():
        # init accumulator with the (tiny, lane-padded) bbox contribution + bias
        acc_ref[...] = (
            jnp.dot(bb_ref[...], w1b_ref[...], preferred_element_type=jnp.float32)
            + b1_ref[...])

    acc_ref[...] += jnp.dot(x_ref[...], w1_ref[...],
                            preferred_element_type=jnp.float32)

    @pl.when(k == pl.num_programs(1) - 1)
    def _():
        h = jnp.maximum(acc_ref[...], 0.0).astype(jnp.bfloat16)
        o_ref[...] = (
            jnp.dot(h, w2_ref[...], preferred_element_type=jnp.float32)
            + b2_ref[...])


def honet_mlp(x, bb, w1, w1b, b1, w2, b2, *, tm, tk):
    n_pad, k_pad = x.shape
    bbf = bb.shape[1]
    hid = w1.shape[1]
    d_out = w2.shape[1]
    grid = (n_pad // tm, k_pad // tk)

    flops = 2 * n_pad * (k_pad + bbf) * hid + 2 * n_pad * hid * d_out
    bytes_accessed = (x.size * 2 + bb.size * 2 + w1.size * 2 + w1b.size * 2
                      + b1.size * 4 + w2.size * 2 + b2.size * 4
                      + n_pad * d_out * 4)

    return pl.pallas_call(
        _honet_mlp_kernel,
        out_shape=jax.ShapeDtypeStruct((n_pad, d_out), jnp.float32),
        grid_spec=pltpu.PrefetchScalarGridSpec(
            num_scalar_prefetch=0,
            grid=grid,
            in_specs=[
                pl.BlockSpec((tm, tk), lambda i, k: (i, k)),      # x
                pl.BlockSpec((tm, bbf), lambda i, k: (i, 0)),     # bbox (lane-padded)
                pl.BlockSpec((tk, hid), lambda i, k: (k, 0)),     # W1 K-tile
                pl.BlockSpec((bbf, hid), lambda i, k: (0, 0)),    # W1_bbox
                pl.BlockSpec((1, hid), lambda i, k: (0, 0)),      # b1
                pl.BlockSpec((hid, d_out), lambda i, k: (0, 0)),  # W2
                pl.BlockSpec((1, d_out), lambda i, k: (0, 0)),    # b2
            ],
            out_specs=pl.BlockSpec((tm, d_out), lambda i, k: (i, 0)),
            scratch_shapes=[pltpu.VMEM((tm, hid), jnp.float32)],
        ),
        compiler_params=pltpu.CompilerParams(
            dimension_semantics=("parallel", "arbitrary"),
            vmem_limit_bytes=32 * 1024 * 1024),
        cost_estimate=pl.CostEstimate(
            flops=flops, transcendentals=0, bytes_accessed=bytes_accessed),
    )(x, bb, w1, w1b, b1, w2, b2)


# ----------------------------------------------------------------------------
# Pallas kernel 2: fused loss reductions (single launch, SMEM vector output)
#   terms[0..4] = per-frame MSE of [verts3d, joints3d, mano_pose, mano_shape,
#                                   joints2d]
#   terms[5..8] = temporal-delta MSE of [verts3d, joints3d, mano_pose,
#                                        mano_shape]  (deltas computed in-kernel)
# ----------------------------------------------------------------------------
NUM_LOSS_TERMS = 9


def _fused_loss_kernel(pred_ref, gt_ref, o_ref, *, n, b, t, ranges):
    # ranges: column ranges in the slab, order [verts, j3d, pose, shape, j2d]
    p = pred_ref[0:n, :]            # drop MXU row padding (static ref slice)
    g = gt_ref[...]
    d = p - g
    sq = d * d
    for i, (c0, c1) in enumerate(ranges):
        o_ref[i] = jnp.sum(sq[:, c0:c1]) * (1.0 / float(n * (c1 - c0)))

    # temporal deltas in-kernel; rows crossing a clip boundary are masked out
    dd = (p[1:, :] - p[:-1, :]) - (g[1:, :] - g[:-1, :])
    row = jax.lax.broadcasted_iota(jnp.int32, (n - 1, 1), 0)
    valid = ((row + 1) % t) != 0
    dsq = jnp.where(valid, dd * dd, 0.0)
    for i in range(4):              # dynamic terms: verts, j3d, pose, shape
        c0, c1 = ranges[i]
        o_ref[5 + i] = jnp.sum(dsq[:, c0:c1]) * (
            1.0 / float(b * (t - 1) * (c1 - c0)))


def fused_loss_terms(pred_slab, gt_slab, *, n, b, t, ranges):
    kernel = functools.partial(_fused_loss_kernel, n=n, b=b, t=t, ranges=ranges)
    return pl.pallas_call(
        kernel,
        out_shape=jax.ShapeDtypeStruct((NUM_LOSS_TERMS,), jnp.float32),
        in_specs=[pl.BlockSpec(memory_space=pltpu.MemorySpace.VMEM)] * 2,
        out_specs=pl.BlockSpec(memory_space=pltpu.MemorySpace.SMEM),
    )(pred_slab, gt_slab)


# ----------------------------------------------------------------------------
# Loss modules: thin lambda containers; the actual reductions are fused into
# the single Pallas loss kernel above (original class bodies not provided).
# ----------------------------------------------------------------------------
class ManoLoss:
    def __init__(self, lambda_verts3d=None, lambda_joints3d=None,
                 lambda_manopose=None, lambda_manoshape=None, loss_base=None):
        self.lambda_verts3d = lambda_verts3d
        self.lambda_joints3d = lambda_joints3d
        self.lambda_manopose = lambda_manopose
        self.lambda_manoshape = lambda_manoshape


class Joint2DLoss:
    def __init__(self, lambda_joints2d=None):
        self.lambda_joints2d = lambda_joints2d


class DynamicManoLoss:
    # TODO(synk): end2end / temporal-constrained terms of the original
    # DynamicManoLoss are not specified in model.py; only per-frame-delta terms.
    def __init__(self, lambda_dynamic_verts3d=None, lambda_dynamic_joints3d=None,
                 lambda_dynamic_manopose=None, lambda_dynamic_manoshape=None,
                 temporal_constrained=False, loss_base=None, **unused):
        self.lambda_dynamic_verts3d = lambda_dynamic_verts3d
        self.lambda_dynamic_joints3d = lambda_dynamic_joints3d
        self.lambda_dynamic_manopose = lambda_dynamic_manopose
        self.lambda_dynamic_manoshape = lambda_dynamic_manoshape


# ----------------------------------------------------------------------------
# Synthetic HONet (backbone + heads); all matmuls inside one Pallas kernel.
# ----------------------------------------------------------------------------
class SynthHONet:
    J = 21        # hand joints
    V = 32        # tiny synthetic vertex count (real MANO has 778)
    POSE = 48     # mano axis-angle pose dims
    SHAPE = 10    # mano shape dims
    HID = 128
    TM = 128      # row tile (>= MXU height; B*T rows are zero-padded to this)
    TK = 256      # K tile over flattened-frame features
    BB = 128      # bbox features lane-padded to a full vreg lane width

    def __init__(self, key, img_shape):
        C, H, W = img_shape
        self.chw = C * H * W
        self.k_pad = _round_up(self.chw, self.TK)
        self.head_dims = [self.J * 2, self.POSE, self.SHAPE,
                          self.V * 3, self.J * 3]
        self.d_out_raw = sum(self.head_dims)
        self.d_out = _round_up(self.d_out_raw, 128)

        k1, k2, k3 = jax.random.split(key, 3)
        w1 = jax.random.normal(k1, (self.chw, self.HID), jnp.float32) * 0.02
        # zero-pad the extra K rows so padding can never corrupt the result
        self.w1 = jnp.pad(
            w1, ((0, self.k_pad - self.chw), (0, 0))).astype(jnp.bfloat16)
        w1b = jax.random.normal(k3, (4, self.HID), jnp.float32) * 0.02
        self.w1_bbox = jnp.pad(
            w1b, ((0, self.BB - 4), (0, 0))).astype(jnp.bfloat16)
        self.b1 = jnp.zeros((1, self.HID), jnp.float32)
        w2 = jax.random.normal(k2, (self.HID, self.d_out_raw), jnp.float32) * 0.02
        self.w2 = jnp.pad(
            w2, ((0, 0), (0, self.d_out - self.d_out_raw))).astype(jnp.bfloat16)
        self.b2 = jnp.zeros((1, self.d_out), jnp.float32)

    def head_ranges(self):
        offs = np.cumsum([0] + self.head_dims)
        return [(int(offs[i]), int(offs[i + 1]))
                for i in range(len(self.head_dims))]

    def __call__(self, imgs, bbox_hand, mano_side=None, mano_params=None):
        B, T = imgs.shape[:2]
        N = B * T
        n_pad = _round_up(max(N, self.TM), self.TM)

        x = imgs.reshape(N, -1).astype(jnp.bfloat16)
        x = jnp.pad(x, ((0, n_pad - N), (0, self.k_pad - self.chw)))
        bb = bbox_hand.reshape(N, -1).astype(jnp.bfloat16)
        bb = jnp.pad(bb, ((0, n_pad - N), (0, self.BB - bb.shape[1])))

        out = honet_mlp(x, bb, self.w1, self.w1_bbox, self.b1, self.w2, self.b2,
                        tm=self.TM, tk=self.TK)

        r = self.head_ranges()   # [j2d, pose, shape, verts, j3d]
        j2d = out[:N, r[0][0]:r[0][1]]
        pose = out[:N, r[1][0]:r[1][1]]
        shape = out[:N, r[2][0]:r[2][1]]
        verts = out[:N, r[3][0]:r[3][1]]
        j3d = out[:N, r[4][0]:r[4][1]]

        preds_joints2d = j2d.reshape(N, self.J, 2)
        pred = {
            "verts3d": verts.reshape(N, self.V, 3),
            "joints3d": j3d.reshape(N, self.J, 3),
            "mano_pose": pose,
            "mano_shape": shape,
            # lane-dense slab of all heads; consumed directly by the fused
            # loss kernel (no re-concat of per-head slices).
            "pred_slab": out,
        }
        gt_mano_results = mano_params   # GT dict passed through (synthetic)
        return preds_joints2d, [pred], gt_mano_results


# ----------------------------------------------------------------------------
# Deformer
# ----------------------------------------------------------------------------
_TERM_INDEX = {
    "mano_verts3d": 0, "mano_joints3d": 1, "manopose": 2, "manoshape": 3,
    "joints2d": 4, "dynamic_verts3d": 5, "dynamic_joints3d": 6,
    "dynamic_manopose": 7, "dynamic_manoshape": 8,
}


class Deformer:
    def __init__(self, honet, mano_lambda_verts3d=None, mano_lambda_joints3d=None,
                 mano_lambda_manopose=None, mano_lambda_manoshape=None,
                 lambda_joints2d=None, lambda_dynamic_verts3d=None,
                 lambda_dynamic_joints3d=None, lambda_dynamic_manopose=None,
                 lambda_dynamic_manoshape=None, temporal_constrained=False,
                 **unused):
        self.honet = honet
        self.mano_loss = ManoLoss(mano_lambda_verts3d, mano_lambda_joints3d,
                                  mano_lambda_manopose, mano_lambda_manoshape)
        self.joint2d_loss = Joint2DLoss(lambda_joints2d)
        self.dynamic_loss = DynamicManoLoss(
            lambda_dynamic_verts3d=lambda_dynamic_verts3d,
            lambda_dynamic_joints3d=lambda_dynamic_joints3d,
            lambda_dynamic_manopose=lambda_dynamic_manopose,
            lambda_dynamic_manoshape=lambda_dynamic_manoshape,
            temporal_constrained=temporal_constrained)
        self.temporal_constrained = temporal_constrained
        self.training = True

    def _build_gt_slab(self, gt_mano, joints_uv, N):
        j2d_dim = self.honet.J * 2
        if joints_uv is not None:
            j2d = joints_uv.reshape(N, -1).astype(jnp.float32)
        else:
            j2d = jnp.zeros((N, j2d_dim), jnp.float32)
        cols = [
            j2d,
            gt_mano["mano_pose"].reshape(N, -1).astype(jnp.float32),
            gt_mano["mano_shape"].reshape(N, -1).astype(jnp.float32),
            gt_mano["verts3d"].reshape(N, -1).astype(jnp.float32),
            gt_mano["joints3d"].reshape(N, -1).astype(jnp.float32),
        ]
        slab = jnp.concatenate(cols, axis=1)
        return jnp.pad(slab, ((0, 0), (0, self.honet.d_out - slab.shape[1])))

    def __call__(self, imgs, bbox_hand, joints_uv=None, joints_xyz=None,
                 mano_side=None, mano_params=None, roots3d=None, coverage=None):
        batch, T = imgs.shape[0:2]
        N = batch * T
        if self.training:
            preds_joints2d, pred_mano_results, gt_mano_results = self.honet(
                imgs, bbox_hand, mano_side=mano_side, mano_params=mano_params)

            losses = {}
            total_loss = jnp.float32(0.0)

            if gt_mano_results is not None:
                pred_slab = pred_mano_results[-1]["pred_slab"]
                gt_slab = self._build_gt_slab(gt_mano_results, joints_uv, N)
                r = self.honet.head_ranges()          # [j2d, pose, shape, verts, j3d]
                ranges = (r[3], r[4], r[1], r[2], r[0])  # verts, j3d, pose, shape, j2d
                terms = fused_loss_terms(pred_slab, gt_slab,
                                         n=N, b=batch, t=T, ranges=ranges)

                weighted = []
                if mano_params is not None:
                    weighted += [
                        ("mano_verts3d", self.mano_loss.lambda_verts3d),
                        ("mano_joints3d", self.mano_loss.lambda_joints3d),
                        ("manopose", self.mano_loss.lambda_manopose),
                        ("manoshape", self.mano_loss.lambda_manoshape)]
                if joints_uv is not None:
                    weighted += [("joints2d", self.joint2d_loss.lambda_joints2d)]
                weighted += [
                    ("dynamic_verts3d", self.dynamic_loss.lambda_dynamic_verts3d),
                    ("dynamic_joints3d", self.dynamic_loss.lambda_dynamic_joints3d),
                    ("dynamic_manopose", self.dynamic_loss.lambda_dynamic_manopose),
                    ("dynamic_manoshape", self.dynamic_loss.lambda_dynamic_manoshape)]
                for name, lam in weighted:
                    if lam is not None:
                        val = terms[_TERM_INDEX[name]]
                        losses[name] = val
                        total_loss = total_loss + lam * val

            losses["total_loss"] = total_loss  # .detach().cpu() has no JAX analog
            clean = [{k: v for k, v in d.items() if k != "pred_slab"}
                     for d in pred_mano_results]
            return total_loss, losses, clean
        else:
            # TODO(synk): original eval path calls honet.module.net_forward with
            # roots3d/coverage; the synthetic honet has no such extras.
            preds_joints, pred_mano_results, _ = self.honet(
                imgs, bbox_hand, mano_side=mano_side, mano_params=None)
            if isinstance(pred_mano_results, list):
                pred_mano_results = pred_mano_results[-1]
            pred_mano_results = {k: v for k, v in pred_mano_results.items()
                                 if k != "pred_slab"}
            return preds_joints, pred_mano_results


# ----------------------------------------------------------------------------
# Main
# ----------------------------------------------------------------------------
if __name__ == "__main__":
    key = jax.random.PRNGKey(0)
    kw, ki, kb, kuv, kgt = jax.random.split(key, 5)

    B, T, C, H, W = 2, 4, 3, 16, 16
    N = B * T
    J, V, POSE, SHAPE = SynthHONet.J, SynthHONet.V, SynthHONet.POSE, SynthHONet.SHAPE

    imgs = jax.random.normal(ki, (B, T, C, H, W), jnp.float32)
    bbox_hand = jax.random.uniform(kb, (B, T, 4), jnp.float32)
    joints_uv = jax.random.normal(kuv, (B, T, J, 2), jnp.float32)
    g1, g2, g3, g4 = jax.random.split(kgt, 4)
    mano_params = {
        "verts3d": jax.random.normal(g1, (N, V, 3), jnp.float32),
        "joints3d": jax.random.normal(g2, (N, J, 3), jnp.float32),
        "mano_pose": jax.random.normal(g3, (N, POSE), jnp.float32),
        "mano_shape": jax.random.normal(g4, (N, SHAPE), jnp.float32),
    }

    honet = SynthHONet(kw, (C, H, W))
    model = Deformer(
        honet,
        mano_lambda_verts3d=1.0, mano_lambda_joints3d=1.0,
        mano_lambda_manopose=0.1, mano_lambda_manoshape=0.1,
        lambda_joints2d=0.5,
        lambda_dynamic_verts3d=0.5, lambda_dynamic_joints3d=0.5,
        lambda_dynamic_manopose=0.05, lambda_dynamic_manoshape=0.05)

    # One jitted training step: backbone kernel + fused loss kernel, one trace.
    @jax.jit
    def train_step(imgs, bbox_hand, joints_uv, mano_params):
        return model(imgs, bbox_hand, joints_uv=joints_uv,
                     mano_params=mano_params)

    total_loss, losses, pred_mano_results = train_step(
        imgs, bbox_hand, joints_uv, mano_params)
    jax.block_until_ready(total_loss)
    jax.block_until_ready(pred_mano_results[-1]["verts3d"])

    # lightweight pure-JAX reference check of a few fused-loss terms
    pred = pred_mano_results[-1]

    def _mse(a, b):
        return jnp.mean((a - b) ** 2)

    def _dyn(a, b):
        a = a.reshape((B, T) + a.shape[1:])
        b = b.reshape((B, T) + b.shape[1:])
        return _mse(a[:, 1:] - a[:, :-1], b[:, 1:] - b[:, :-1])

    tol = dict(rtol=1e-3, atol=1e-5)
    np.testing.assert_allclose(
        losses["mano_verts3d"], _mse(pred["verts3d"], mano_params["verts3d"]), **tol)
    np.testing.assert_allclose(
        losses["manoshape"], _mse(pred["mano_shape"], mano_params["mano_shape"]), **tol)
    np.testing.assert_allclose(
        losses["dynamic_joints3d"], _dyn(pred["joints3d"], mano_params["joints3d"]), **tol)

    print("KERNEL_OK")
</pallas_src>

<mosaic_0001>
module attributes {stable_mosaic.version = 11 : i64} {
  func.func @_honet_mlp_kernel(%arg0: i32, %arg1: i32, %arg2: memref<128x256xbf16, #tpu.memory_space<vmem>>, %arg3: memref<128x128xbf16, #tpu.memory_space<vmem>>, %arg4: memref<256x128xbf16, #tpu.memory_space<vmem>>, %arg5: memref<128x128xbf16, #tpu.memory_space<vmem>>, %arg6: memref<1x128xf32, #tpu.memory_space<vmem>>, %arg7: memref<128x384xbf16, #tpu.memory_space<vmem>>, %arg8: memref<1x384xf32, #tpu.memory_space<vmem>>, %arg9: memref<128x384xf32, #tpu.memory_space<vmem>>, %arg10: memref<128x128xf32, #tpu.memory_space<vmem>>) attributes {dimension_semantics = [#tpu.dimension_semantics<parallel>, #tpu.dimension_semantics<arbitrary>], iteration_bounds = array<i64: 1, 3>, scalar_prefetch = 0 : i64, scratch_operands = 1 : i64, tpu.core_type = #tpu.core_type<tc>, window_params = [{transform_indices = @transform_0, window_bounds = array<i64: 128, 256>}, {transform_indices = @transform_1, window_bounds = array<i64: 128, 128>}, {transform_indices = @transform_2, window_bounds = array<i64: 256, 128>}, {pipeline_mode = #tpu.pipeline_mode<synchronous>, transform_indices = @transform_3, window_bounds = array<i64: 128, 128>}, {pipeline_mode = #tpu.pipeline_mode<synchronous>, transform_indices = @transform_4, window_bounds = array<i64: 1, 128>}, {pipeline_mode = #tpu.pipeline_mode<synchronous>, transform_indices = @transform_5, window_bounds = array<i64: 128, 384>}, {pipeline_mode = #tpu.pipeline_mode<synchronous>, transform_indices = @transform_6, window_bounds = array<i64: 1, 384>}, {transform_indices = @transform_7, window_bounds = array<i64: 128, 384>}]} {
    %c0_i32 = arith.constant 0 : i32
    %0 = arith.cmpi eq, %arg1, %c0_i32 : i32
    %1 = arith.extui %0 : i1 to i32
    %c0_i32_0 = arith.constant 0 : i32
    %2 = arith.cmpi ne, %1, %c0_i32_0 : i32
    scf.if %2 {
      %c0_9 = arith.constant 0 : index
      %c0_10 = arith.constant 0 : index
      %12 = vector.load %arg3[%c0_9, %c0_10] : memref<128x128xbf16, #tpu.memory_space<vmem>>, vector<128x128xbf16>
      %c0_11 = arith.constant 0 : index
      %c0_12 = arith.constant 0 : index
      %13 = vector.load %arg5[%c0_11, %c0_12] : memref<128x128xbf16, #tpu.memory_space<vmem>>, vector<128x128xbf16>
      %cst_13 = arith.constant dense<0.000000e+00> : vector<128x128xf32>
      %14 = tpu.matmul %12, %13, %cst_13 {dimension_numbers = #tpu.dot_dimension_numbers<[1], [0], [0], [1], [0, 0, 1, 1], [], []>} : vector<128x128xbf16>, vector<128x128xbf16>, vector<128x128xf32> -> vector<128x128xf32>
      %c0_14 = arith.constant 0 : index
      %c0_15 = arith.constant 0 : index
      %15 = vector.load %arg6[%c0_14, %c0_15] : memref<1x128xf32, #tpu.memory_space<vmem>>, vector<1x128xf32>
      %16 = vector.broadcast %15 : vector<1x128xf32> to vector<128x128xf32>
      %17 = arith.addf %14, %16 : vector<128x128xf32>
      %c0_16 = arith.constant 0 : index
      %c0_17 = arith.constant 0 : index
      %18 = vector.load %arg10[%c0_16, %c0_17] : memref<128x128xf32, #tpu.memory_space<vmem>>, vector<128x128xf32>
      tpu.vector_store %arg10[%c0_16, %c0_17], %17 {strides = array<i32>} : memref<128x128xf32, #tpu.memory_space<vmem>>, vector<128x128xf32>,
    } else {
    }
    %c0 = arith.constant 0 : index
    %c0_1 = arith.constant 0 : index
    %3 = vector.load %arg10[%c0, %c0_1] : memref<128x128xf32, #tpu.memory_space<vmem>>, vector<128x128xf32>
    %c0_2 = arith.constant 0 : index
    %c0_3 = arith.constant 0 : index
    %4 = vector.load %arg2[%c0_2, %c0_3] : memref<128x256xbf16, #tpu.memory_space<vmem>>, vector<128x256xbf16>
    %c0_4 = arith.constant 0 : index
    %c0_5 = arith.constant 0 : index
    %5 = vector.load %arg4[%c0_4, %c0_5] : memref<256x128xbf16, #tpu.memory_space<vmem>>, vector<256x128xbf16>
    %cst = arith.constant dense<0.000000e+00> : vector<128x128xf32>
    %6 = tpu.matmul %4, %5, %cst {dimension_numbers = #tpu.dot_dimension_numbers<[1], [0], [0], [1], [0, 0, 1, 1], [], []>} : vector<128x256xbf16>, vector<256x128xbf16>, vector<128x128xf32> -> vector<128x128xf32>
    %7 = arith.addf %3, %6 : vector<128x128xf32>
    %c0_6 = arith.constant 0 : index
    %c0_7 = arith.constant 0 : index
    %8 = vector.load %arg10[%c0_6, %c0_7] : memref<128x128xf32, #tpu.memory_space<vmem>>, vector<128x128xf32>
    tpu.vector_store %arg10[%c0_6, %c0_7], %7 {strides = array<i32>} : memref<128x128xf32, #tpu.memory_space<vmem>>, vector<128x128xf32>,
    %c2_i32 = arith.constant 2 : i32
    %9 = arith.cmpi eq, %arg1, %c2_i32 : i32
    %10 = arith.extui %9 : i1 to i32
    %c0_i32_8 = arith.constant 0 : i32
    %11 = arith.cmpi ne, %10, %c0_i32_8 : i32
    scf.if %11 {
      %c0_9 = arith.constant 0 : index
      %c0_10 = arith.constant 0 : index
      %12 = vector.load %arg10[%c0_9, %c0_10] : memref<128x128xf32, #tpu.memory_space<vmem>>, vector<128x128xf32>
      %cst_11 = arith.constant 0.000000e+00 : f32
      %13 = vector.broadcast %cst_11 : f32 to vector<128x128xf32>
      %14 = arith.maximumf %12, %13 : vector<128x128xf32>
      %15 = arith.truncf %14 : vector<128x128xf32> to vector<128x128xbf16>
      %c0_12 = arith.constant 0 : index
      %c0_13 = arith.constant 0 : index
      %16 = vector.load %arg7[%c0_12, %c0_13] : memref<128x384xbf16, #tpu.memory_space<vmem>>, vector<128x384xbf16>
      %cst_14 = arith.constant dense<0.000000e+00> : vector<128x384xf32>
      %17 = tpu.matmul %15, %16, %cst_14 {dimension_numbers = #tpu.dot_dimension_numbers<[1], [0], [0], [1], [0, 0, 1, 1], [], []>} : vector<128x128xbf16>, vector<128x384xbf16>, vector<128x384xf32> -> vector<128x384xf32>
      %c0_15 = arith.constant 0 : index
      %c0_16 = arith.constant 0 : index
      %18 = vector.load %arg8[%c0_15, %c0_16] : memref<1x384xf32, #tpu.memory_space<vmem>>, vector<1x384xf32>
      %19 = vector.broadcast %18 : vector<1x384xf32> to vector<128x384xf32>
      %20 = arith.addf %17, %19 : vector<128x384xf32>
      %c0_17 = arith.constant 0 : index
      %c0_18 = arith.constant 0 : index
      %21 = vector.load %arg9[%c0_17, %c0_18] : memref<128x384xf32, #tpu.memory_space<vmem>>, vector<128x384xf32>
      tpu.vector_store %arg9[%c0_17, %c0_18], %20 {strides = array<i32>} : memref<128x384xf32, #tpu.memory_space<vmem>>, vector<128x384xf32>,
    } else {
    }
    return
  }
  func.func @transform_0(%arg0: i32, %arg1: i32) -> (i32, i32) {
    %c0_i32 = arith.constant 0 : i32
    return %arg0, %arg1 : i32, i32
  }
  func.func @transform_1(%arg0: i32, %arg1: i32) -> (i32, i32) {
    %c0_i32 = arith.constant 0 : i32
    %c0_i32_0 = arith.constant 0 : i32
    return %arg0, %c0_i32 : i32, i32
  }
  func.func @transform_2(%arg0: i32, %arg1: i32) -> (i32, i32) {
    %c0_i32 = arith.constant 0 : i32
    %c0_i32_0 = arith.constant 0 : i32
    return %arg1, %c0_i32 : i32, i32
  }
  func.func @transform_3(%arg0: i32, %arg1: i32) -> (i32, i32) {
    %c0_i32 = arith.constant 0 : i32
    %c0_i32_0 = arith.constant 0 : i32
    %c0_i32_1 = arith.constant 0 : i32
    return %c0_i32, %c0_i32_0 : i32, i32
  }
  func.func @transform_4(%arg0: i32, %arg1: i32) -> (i32, i32) {
    %c0_i32 = arith.constant 0 : i32
    %c0_i32_0 = arith.constant 0 : i32
    %c0_i32_1 = arith.constant 0 : i32
    return %c0_i32, %c0_i32_0 : i32, i32
  }
  func.func @transform_5(%arg0: i32, %arg1: i32) -> (i32, i32) {
    %c0_i32 = arith.constant 0 : i32
    %c0_i32_0 = arith.constant 0 : i32
    %c0_i32_1 = arith.constant 0 : i32
    return %c0_i32, %c0_i32_0 : i32, i32
  }
  func.func @transform_6(%arg0: i32, %arg1: i32) -> (i32, i32) {
    %c0_i32 = arith.constant 0 : i32
    %c0_i32_0 = arith.constant 0 : i32
    %c0_i32_1 = arith.constant 0 : i32
    return %c0_i32, %c0_i32_0 : i32, i32
  }
  func.func @transform_7(%arg0: i32, %arg1: i32) -> (i32, i32) {
    %c0_i32 = arith.constant 0 : i32
    %c0_i32_0 = arith.constant 0 : i32
    return %arg0, %c0_i32 : i32, i32
  }
}

module attributes {stable_mosaic.version = 11 : i64} {
  func.func @_fused_loss_kernel(%arg0: memref<128x384xf32, #tpu.memory_space<vmem>>, %arg1: memref<8x384xf32, #tpu.memory_space<vmem>>, %arg2: memref<9xf32, #tpu.memory_space<smem>>) attributes {dimension_semantics = [], scalar_prefetch = 0 : i64, scratch_operands = 0 : i64, tpu.core_type = #tpu.core_type<tc>} {
    %c0 = arith.constant 0 : index
    %c0_0 = arith.constant 0 : index
    %0 = vector.load %arg0[%c0, %c0_0] : memref<128x384xf32, #tpu.memory_space<vmem>>, vector<8x384xf32>
    %c0_1 = arith.constant 0 : index
    %c0_2 = arith.constant 0 : index
    %1 = vector.load %arg1[%c0_1, %c0_2] : memref<8x384xf32, #tpu.memory_space<vmem>>, vector<8x384xf32>
    %2 = arith.subf %0, %1 : vector<8x384xf32>
    %3 = arith.mulf %2, %2 : vector<8x384xf32>
    %4 = vector.extract_strided_slice %3 {offsets = [0, 100], sizes = [8, 96], strides = [1, 1]} : vector<8x384xf32> to vector<8x96xf32>
    %5 = vector.shape_cast %4 : vector<8x96xf32> to vector<1x8x96xf32>
    %cst = arith.constant dense<0.000000e+00> : vector<1xf32>
    %6 = vector.multi_reduction <add>, %5, %cst [1, 2] : vector<1x8x96xf32> to vector<1xf32>
    %7 = vector.shape_cast %6 : vector<1xf32> to vector<1x1x1xf32>
    %8 = vector.extract %7[0, 0, 0] : f32 from vector<1x1x1xf32>
    %cst_3 = arith.constant 0.00130208337 : f32
    %9 = arith.mulf %8, %cst_3 : f32
    %c0_4 = arith.constant 0 : index
    %10 = memref.load %arg2[%c0_4] : memref<9xf32, #tpu.memory_space<smem>>
    memref.store %9, %arg2[%c0_4] : memref<9xf32, #tpu.memory_space<smem>>
    %11 = vector.extract_strided_slice %3 {offsets = [0, 196], sizes = [8, 63], strides = [1, 1]} : vector<8x384xf32> to vector<8x63xf32>
    %12 = vector.shape_cast %11 : vector<8x63xf32> to vector<1x8x63xf32>
    %cst_5 = arith.constant dense<0.000000e+00> : vector<1xf32>
    %13 = vector.multi_reduction <add>, %12, %cst_5 [1, 2] : vector<1x8x63xf32> to vector<1xf32>
    %14 = vector.shape_cast %13 : vector<1xf32> to vector<1x1x1xf32>
    %15 = vector.extract %14[0, 0, 0] : f32 from vector<1x1x1xf32>
    %cst_6 = arith.constant 0.0019841271 : f32
    %16 = arith.mulf %15, %cst_6 : f32
    %c1 = arith.constant 1 : index
    %17 = memref.load %arg2[%c1] : memref<9xf32, #tpu.memory_space<smem>>
    memref.store %16, %arg2[%c1] : memref<9xf32, #tpu.memory_space<smem>>
    %18 = vector.extract_strided_slice %3 {offsets = [0, 42], sizes = [8, 48], strides = [1, 1]} : vector<8x384xf32> to vector<8x48xf32>
    %19 = vector.shape_cast %18 : vector<8x48xf32> to vector<1x8x48xf32>
    %cst_7 = arith.constant dense<0.000000e+00> : vector<1xf32>
    %20 = vector.multi_reduction <add>, %19, %cst_7 [1, 2] : vector<1x8x48xf32> to vector<1xf32>
    %21 = vector.shape_cast %20 : vector<1xf32> to vector<1x1x1xf32>
    %22 = vector.extract %21[0, 0, 0] : f32 from vector<1x1x1xf32>
    %cst_8 = arith.constant 0.00260416674 : f32
    %23 = arith.mulf %22, %cst_8 : f32
    %c2 = arith.constant 2 : index
    %24 = memref.load %arg2[%c2] : memref<9xf32, #tpu.memory_space<smem>>
    memref.store %23, %arg2[%c2] : memref<9xf32, #tpu.memory_space<smem>>
    %25 = vector.extract_strided_slice %3 {offsets = [0, 90], sizes = [8, 10], strides = [1, 1]} : vector<8x384xf32> to vector<8x10xf32>
    %26 = vector.shape_cast %25 : vector<8x10xf32> to vector<1x8x10xf32>
    %cst_9 = arith.constant dense<0.000000e+00> : vector<1xf32>
    %27 = vector.multi_reduction <add>, %26, %cst_9 [1, 2] : vector<1x8x10xf32> to vector<1xf32>
    %28 = vector.shape_cast %27 : vector<1xf32> to vector<1x1x1xf32>
    %29 = vector.extract %28[0, 0, 0] : f32 from vector<1x1x1xf32>
    %cst_10 = arith.constant 1.250000e-02 : f32
    %30 = arith.mulf %29, %cst_10 : f32
    %c3 = arith.constant 3 : index
    %31 = memref.load %arg2[%c3] : memref<9xf32, #tpu.memory_space<smem>>
    memref.store %30, %arg2[%c3] : memref<9xf32, #tpu.memory_space<smem>>
    %32 = vector.extract_strided_slice %3 {offsets = [0, 0], sizes = [8, 42], strides = [1, 1]} : vector<8x384xf32> to vector<8x42xf32>
    %33 = vector.shape_cast %32 : vector<8x42xf32> to vector<1x8x42xf32>
    %cst_11 = arith.constant dense<0.000000e+00> : vector<1xf32>
    %34 = vector.multi_reduction <add>, %33, %cst_11 [1, 2] : vector<1x8x42xf32> to vector<1xf32>
    %35 = vector.shape_cast %34 : vector<1xf32> to vector<1x1x1xf32>
    %36 = vector.extract %35[0, 0, 0] : f32 from vector<1x1x1xf32>
    %cst_12 = arith.constant 0.00297619053 : f32
    %37 = arith.mulf %36, %cst_12 : f32
    %c4 = arith.constant 4 : index
    %38 = memref.load %arg2[%c4] : memref<9xf32, #tpu.memory_space<smem>>
    memref.store %37, %arg2[%c4] : memref<9xf32, #tpu.memory_space<smem>>
    %39 = vector.extract_strided_slice %0 {offsets = [1, 0], sizes = [7, 384], strides = [1, 1]} : vector<8x384xf32> to vector<7x384xf32>
    %40 = vector.extract_strided_slice %0 {offsets = [0, 0], sizes = [7, 384], strides = [1, 1]} : vector<8x384xf32> to vector<7x384xf32>
    %41 = arith.subf %39, %40 : vector<7x384xf32>
    %42 = vector.extract_strided_slice %1 {offsets = [1, 0], sizes = [7, 384], strides = [1, 1]} : vector<8x384xf32> to vector<7x384xf32>
    %43 = vector.extract_strided_slice %1 {offsets = [0, 0], sizes = [7, 384], strides = [1, 1]} : vector<8x384xf32> to vector<7x384xf32>
    %44 = arith.subf %42, %43 : vector<7x384xf32>
    %45 = arith.subf %41, %44 : vector<7x384xf32>
    %46 = tpu.iota {dimensions = array<i32: 0>} : vector<7x1xi32>
    %c1_i32 = arith.constant 1 : i32
    %47 = vector.broadcast %c1_i32 : i32 to vector<7x1xi32>
    %48 = arith.addi %46, %47 : vector<7x1xi32>
    %c4_i32 = arith.constant 4 : i32
    %c0_i32 = arith.constant 0 : i32
    %49 = arith.cmpi eq, %c4_i32, %c0_i32 : i32
    %c1_i32_13 = arith.constant 1 : i32
    %50 = arith.select %49, %c1_i32_13, %c4_i32 : i32
    %51 = vector.broadcast %50 : i32 to vector<7x1xi32>
    %52 = arith.remsi %48, %51 : vector<7x1xi32>
    %c0_i32_14 = arith.constant 0 : i32
    %53 = vector.broadcast %c0_i32_14 : i32 to vector<7x1xi32>
    %54 = arith.cmpi ne, %52, %53 : vector<7x1xi32>
    %c0_i32_15 = arith.constant 0 : i32
    %55 = vector.broadcast %c0_i32_15 : i32 to vector<7x1xi32>
    %56 = arith.cmpi slt, %52, %55 : vector<7x1xi32>
    %c0_i32_16 = arith.constant 0 : i32
    %57 = arith.cmpi slt, %50, %c0_i32_16 : i32
    %58 = vector.broadcast %57 : i1 to vector<7x1xi1>
    %59 = vector.broadcast %58 : vector<7x1xi1> to vector<7x1xi1>
    %60 = arith.xori %56, %59 : vector<7x1xi1>
    %61 = arith.andi %60, %54 : vector<7x1xi1>
    %62 = vector.broadcast %50 : i32 to vector<7x1xi32>
    %63 = arith.addi %52, %62 : vector<7x1xi32>
    %64 = arith.select %61, %63, %52 : vector<7x1xi1>, vector<7x1xi32>
    %c0_i32_17 = arith.constant 0 : i32
    %65 = vector.broadcast %c0_i32_17 : i32 to vector<7x1xi32>
    %66 = arith.cmpi ne, %64, %65 : vector<7x1xi32>
    %67 = arith.mulf %45, %45 : vector<7x384xf32>
    %cst_18 = arith.constant 0.000000e+00 : f32
    %68 = vector.shape_cast %66 : vector<7x1xi1> to vector<7x1xi1>
    %69 = vector.broadcast %68 : vector<7x1xi1> to vector<7x384xi1>
    %70 = vector.broadcast %cst_18 : f32 to vector<7x384xf32>
    %71 = arith.select %69, %67, %70 : vector<7x384xi1>, vector<7x384xf32>
    %72 = vector.extract_strided_slice %71 {offsets = [0, 100], sizes = [7, 96], strides = [1, 1]} : vector<7x384xf32> to vector<7x96xf32>
    %73 = vector.shape_cast %72 : vector<7x96xf32> to vector<1x7x96xf32>
    %cst_19 = arith.constant dense<0.000000e+00> : vector<1xf32>
    %74 = vector.multi_reduction <add>, %73, %cst_19 [1, 2] : vector<1x7x96xf32> to vector<1xf32>
    %75 = vector.shape_cast %74 : vector<1xf32> to vector<1x1x1xf32>
    %76 = vector.extract %75[0, 0, 0] : f32 from vector<1x1x1xf32>
    %cst_20 = arith.constant 0.00173611112 : f32
    %77 = arith.mulf %76, %cst_20 : f32
    %c5 = arith.constant 5 : index
    %78 = memref.load %arg2[%c5] : memref<9xf32, #tpu.memory_space<smem>>
    memref.store %77, %arg2[%c5] : memref<9xf32, #tpu.memory_space<smem>>
    %79 = vector.extract_strided_slice %71 {offsets = [0, 196], sizes = [7, 63], strides = [1, 1]} : vector<7x384xf32> to vector<7x63xf32>
    %80 = vector.shape_cast %79 : vector<7x63xf32> to vector<1x7x63xf32>
    %cst_21 = arith.constant dense<0.000000e+00> : vector<1xf32>
    %81 = vector.multi_reduction <add>, %80, %cst_21 [1, 2] : vector<1x7x63xf32> to vector<1xf32>
    %82 = vector.shape_cast %81 : vector<1xf32> to vector<1x1x1xf32>
    %83 = vector.extract %82[0, 0, 0] : f32 from vector<1x1x1xf32>
    %cst_22 = arith.constant 0.00264550257 : f32
    %84 = arith.mulf %83, %cst_22 : f32
    %c6 = arith.constant 6 : index
    %85 = memref.load %arg2[%c6] : memref<9xf32, #tpu.memory_space<smem>>
    memref.store %84, %arg2[%c6] : memref<9xf32, #tpu.memory_space<smem>>
    %86 = vector.extract_strided_slice %71 {offsets = [0, 42], sizes = [7, 48], strides = [1, 1]} : vector<7x384xf32> to vector<7x48xf32>
    %87 = vector.shape_cast %86 : vector<7x48xf32> to vector<1x7x48xf32>
    %cst_23 = arith.constant dense<0.000000e+00> : vector<1xf32>
    %88 = vector.multi_reduction <add>, %87, %cst_23 [1, 2] : vector<1x7x48xf32> to vector<1xf32>
    %89 = vector.shape_cast %88 : vector<1xf32> to vector<1x1x1xf32>
    %90 = vector.extract %89[0, 0, 0] : f32 from vector<1x1x1xf32>
    %cst_24 = arith.constant 0.00347222225 : f32
    %91 = arith.mulf %90, %cst_24 : f32
    %c7 = arith.constant 7 : index
    %92 = memref.load %arg2[%c7] : memref<9xf32, #tpu.memory_space<smem>>
    memref.store %91, %arg2[%c7] : memref<9xf32, #tpu.memory_space<smem>>
    %93 = vector.extract_strided_slice %71 {offsets = [0, 90], sizes = [7, 10], strides = [1, 1]} : vector<7x384xf32> to vector<7x10xf32>
    %94 = vector.shape_cast %93 : vector<7x10xf32> to vector<1x7x10xf32>
    %cst_25 = arith.constant dense<0.000000e+00> : vector<1xf32>
    %95 = vector.multi_reduction <add>, %94, %cst_25 [1, 2] : vector<1x7x10xf32> to vector<1xf32>
    %96 = vector.shape_cast %95 : vector<1xf32> to vector<1x1x1xf32>
    %97 = vector.extract %96[0, 0, 0] : f32 from vector<1x1x1xf32>
    %cst_26 = arith.constant 0.0166666675 : f32
    %98 = arith.mulf %97, %cst_26 : f32
    %c8 = arith.constant 8 : index
    %99 = memref.load %arg2[%c8] : memref<9xf32, #tpu.memory_space<smem>>
    memref.store %98, %arg2[%c8] : memref<9xf32, #tpu.memory_space<smem>>
    return
  }
}

</mosaic_0001>

<bundles_post_ra>
// kernel: train_step.3
= control target key start
LH: loop header
LB: loop body
LE: loop exit
PB: predicated region body
PF: predicated region fallthrough
CT: control target
= control target key end

     0   :  { %v144_v3 = vlaneseq  ;;  %s347_s0 = inlined_call_operand.vmem [shape: f32[128,384], index: 0, kind: input, shape index: {}]   ;;  %s348_s1 = inlined_call_operand.vmem [shape: f32[8,384], index: 1, kind: input, shape index: {}]   ;;  %s349_s2 = inlined_call_operand.vmem [shape: f32[9], index: 2, kind: output, shape index: {}]  }
   0x1   :  { %v12_v0 = vld [vmem:[%s347_s0] sm:$0xff]  ;;  %v13_v2 = vld [vmem:[%s347_s0 + $0x8] sm:$0xff]  ;;  %v14_v7 = vld [vmem:[%s347_s0 + $0x10] sm:$0xff] }
   0x2   :  { %v15_v1 = vld [vmem:[%s348_s1] sm:$0xff]  ;;  %v16_v5 = vld [vmem:[%s348_s1 + $0x8] sm:$0xff]  ;;  %v121_v6 = vrot.slane %v13_v2, 7  ;;  %v17_v8 = vld [vmem:[%s348_s1 + $0x10] sm:$0xff]  ;;  %v120_v9 = vrot.slane %v12_v0, 7  ;;  %v122_v12 = vrot.slane %v14_v7, 7 }
   0x3   :  { %v18_v4 = vsub.f32 %v12_v0, %v15_v1  ;;  %v19_v10 = vsub.f32 %v13_v2, %v16_v5  ;;  %v133_v11 = vrot.slane %v16_v5, 7  ;;  %v134_v13 = vrot.slane %v17_v8, 7 }
   0x4   :  { %7 = vsyncpa [#allocation3], 0  ;;  %v127_v15 = vsub.f32 %v13_v2, %v121_v6  ;;  %v145_v16 = vshrl.u32 %v144_v3, 7  ;;  %v128_v19 = vsub.f32 %v14_v7, %v122_v12  ;;  %s306_s21 = smov 28   ;;  %v20_v22 = vsub.f32 %v14_v7, %v17_v8  ;;  %s307_s0 = smov 60  }
   0x5   :  { %v21_v14 = vmul.f32 %v18_v4, %v18_v4  ;;  %v22_v17 = vmul.f32 %v19_v10, %v19_v10  ;;  %v139_v18 = vsub.f32 %v16_v5, %v133_v11  ;;  %v140_v20 = vsub.f32 %v17_v8, %v134_v13  ;;  %s308_s1 = smov 38   ;;  %s309_s22 = smov 86  }
   0x6   :  { %v146_v21 = vadd.s32 1, %v145_v16  ;;  %v126_v23 = vsub.f32 %v12_v0, %v120_v9  ;;  %v132_v24 = vrot.slane %v15_v1, 7  ;;  %v23_v30 = vmul.f32 %v20_v22, %v20_v22  ;;  %s260_s8 = sshll.u32 %s349_s2, 4  ;;  %s261_s8 = int_to_ptr.vmem [resolvable:$true] %s260_s8 }
   0x7   :  { %26 = vrot.lane.b32.xlu0 %v21_v14, %s306_s21  ;;  %48 = vrot.lane.b32.xlu1 %v22_v17, %s307_s0  ;;  %v143_v25 = vsub.f32 %v128_v19, %v140_v20  ;;  %v142_v26 = vsub.f32 %v127_v15, %v139_v18  ;;  %vm103_vm1 = vcmask 343040   ;;  %vm89_vm2 = vcmask 80896   ;;  %s292_s16 = scalar_lea.vmem %s261_s8, 16  ;;  %p297_p1 = scmp.lt.s32.totalorder %s261_s8, %s261_s8 }
   0x8   :  { %v151_v27 = vand.u32 3, %v146_v21  ;;  %v138_v28 = vsub.f32 %v15_v1, %v132_v24  ;;  %v104_v40 = vsel %vm103_vm1, %v21_v14, 0.0  ;;  %vm52_vm3 = vcmask 490496   ;;  %p293_p0 = scmp.ne.s32.totalorder %s261_s8, %s292_s16  ;;  %p298_p2 = scmp.lt.s32.totalorder %s292_s16, %s292_s16 }
   0x9   :  { %v162_v29 = vmul.f32 %v143_v25, %v143_v25  ;;  %v161_v33 = vmul.f32 %v142_v26, %v142_v26  ;;  %vm55_vm4 = vcmask 515072   ;;  %vm206_vm5 = vcmask 514048  }
   0xa   :  { %vm159_vm0 = vcmp.ne.s32.totalorder %v151_v27, 0  ;;  %v141_v31 = vsub.f32 %v126_v23, %v138_v28  ;;  %vm240_vm6 = vcmask 79872   ;;  %vm72_vm7 = vcmask 392192   ;;  %p299_p3 = por %p298_p2, %p297_p1 }
   0xb   :  { %28 = vrot.lane.b32.xlu0 %v22_v17, %s306_s21  ;;  %v170_v32 = vrot.slane %v162_v29, 1  ;;  %v169_v37 = vrot.slane %v161_v33, 1  ;;  %vm30_vm8 = vcmask 228352   ;;  %vm33_vm9 = vcmask 785408  }
   0xc   :  { %v160_v34 = vmul.f32 %v141_v31, %v141_v31  ;;  %vm185_vm10 = vcmask 784384   ;;  %vm223_vm11 = vcmask 391168   ;;  %p300_p4 = pnand %p299_p3, %p293_p0 }
   0xd   :  { %v176_v35 = vsel %vm159_vm0, %v170_v32, 0.0  ;;  %v175_v39 = vsel %vm159_vm0, %v169_v37, 0.0 }
   0xe   :  { %202 = vrot.lane.b32.xlu1 %v176_v35, %s307_s0  ;;  %v168_v36 = vrot.slane %v160_v34, 1 }
   0xf   :  { %50 = vrot.lane.b32.xlu0 %v23_v30, %s307_s0 }
  0x10   :  { %v174_v38 = vsel %vm159_vm0, %v168_v36, 0.0 }
  0x12   :  { %86 = vrot.lane.b32.xlu1 %v21_v14, %s308_s1 }
  0x13   :  { %179 = vrot.lane.b32.xlu0 %v174_v38, %s306_s21 }
  0x16   :  { %237 = vrot.lane.b32.xlu1 %v174_v38, %s308_s1 }
  0x17   :  { %181 = vrot.lane.b32.xlu0 %v175_v39, %s306_s21 }
  0x1b   :  { %200 = vrot.lane.b32.xlu0 %v175_v39, %s307_s0 }
  0x1f   :  { %69 = vrot.lane.b32.xlu0 %v21_v14, %s309_s22 }
  0x23   :  { %220 = vrot.lane.b32.xlu0 %v174_v38, %s309_s22 }
  0x42   :  { %105 = vadd.xlane.f32.xlu0 %v104_v40 }
  0x79   :  { %v27_v41 = vpop.permute.xlu0 %26  ;;  %v49_v42 = vpop.permute.xlu1 %48 }
  0x7d   :  { %v29_v43 = vpop.permute.xlu0 %28 }
  0x7e   :  { %v31_v59 = vsel %vm30_vm8, %v27_v41, %v29_v43 }
  0x7f   :  { %v34_v60 = vsel %vm33_vm9, %v31_v59, 0.0 }
  0x80   :  { %v203_v44 = vpop.permute.xlu1 %202 }
  0x81   :  { %v51_v45 = vpop.permute.xlu0 %50 }
  0x82   :  { %v53_v49 = vsel %vm52_vm3, %v49_v42, %v51_v45 }
  0x83   :  { %v56_v51 = vsel %vm55_vm4, %v53_v49, 0.0 }
  0x84   :  { %v87_v46 = vpop.permute.xlu1 %86 }
  0x85   :  { %v180_v47 = vpop.permute.xlu0 %179  ;;  %v90_v48 = vsel %vm89_vm2, %v87_v46, 0.0 }
  0x86   :  { %91 = vadd.xlane.f32.xlu0 %v90_v48 }
  0x88   :  { %v238_v54 = vpop.permute.xlu1 %237 }
  0x89   :  { %v182_v50 = vpop.permute.xlu0 %181  ;;  %v241_v57 = vsel %vm240_vm6, %v238_v54, 0.0 }
  0x8a   :  { %57 = vadd.xlane.f32.xlu0 %v56_v51  ;;  %v183_v61 = vsel %vm30_vm8, %v180_v47, %v182_v50 }
  0x8b   :  { %v186_v63 = vsel %vm185_vm10, %v183_v61, 0.0 }
  0x8d   :  { %v201_v52 = vpop.permute.xlu0 %200 }
  0x8e   :  { %v204_v53 = vsel %vm52_vm3, %v201_v52, %v203_v44 }
  0x8f   :  { %v207_v55 = vsel %vm206_vm5, %v204_v53, 0.0 }
  0x90   :  { %208 = vadd.xlane.f32.xlu0 %v207_v55 }
  0x91   :  { %v70_v56 = vpop.permute.xlu0 %69 }
  0x92   :  { %v73_v58 = vsel %vm72_vm7, %v70_v56, 0.0 }
  0x93   :  { %74 = vadd.xlane.f32.xlu1 %v73_v58 }
  0x94   :  { %242 = vadd.xlane.f32.xlu0 %v241_v57 }
  0x95   :  { %v221_v62 = vpop.permute.xlu0 %220 }
  0x96   :  { %v224_v0 = vsel %vm223_vm11, %v221_v62, 0.0 }
  0x97   :  { %35 = vadd.xlane.f32.xlu1 %v34_v60 }
  0x9b   :  { %187 = vadd.xlane.f32.xlu1 %v186_v63 }
  0x9f   :  { %225 = vadd.xlane.f32.xlu1 %v224_v0 }
  0xcf   :  { %v106_v1 = vpop.xlane.xlu0 %105 }
  0xd0   :  { %v107_v7 = vrot.slane %v106_v1, 4 }
  0xd2   :  { %v108_v14 = vadd.f32 %v107_v7, %v106_v1 }
  0xd4   :  { %v109_v23 = vrot.slane %v108_v14, 2 }
  0xd6   :  { %v110_v35 = vadd.f32 %v109_v23, %v108_v14 }
  0xd8   :  { %v111_v47 = vrot.slane %v110_v35, 1 }
  0xda   :  { %v112_v57 = vadd.f32 %v111_v47, %v110_v35 }
 0x113   :  { %v92_v2 = vpop.xlane.xlu0 %91 }
 0x114   :  { %v93_v6 = vrot.slane %v92_v2, 4 }
 0x116   :  { %v94_v13 = vadd.f32 %v93_v6, %v92_v2 }
 0x117   :  { %v58_v3 = vpop.xlane.xlu0 %57 }
 0x118   :  { %v59_v4 = vrot.slane %v58_v3, 4  ;;  %v95_v22 = vrot.slane %v94_v13, 2 }
 0x11a   :  { %v60_v8 = vadd.f32 %v59_v4, %v58_v3  ;;  %v96_v32 = vadd.f32 %v95_v22, %v94_v13 }
 0x11c   :  { %v61_v16 = vrot.slane %v60_v8, 2  ;;  %v97_v44 = vrot.slane %v96_v32, 1 }
 0x11d   :  { %v209_v5 = vpop.xlane.xlu0 %208 }
 0x11e   :  { %v210_v9 = vrot.slane %v209_v5, 4  ;;  %v62_v28 = vadd.f32 %v61_v16, %v60_v8  ;;  %v98_v55 = vadd.f32 %v97_v44, %v96_v32 }
 0x120   :  { %v75_v10 = vpop.xlane.xlu1 %74  ;;  %v211_v17 = vadd.f32 %v210_v9, %v209_v5  ;;  %v63_v38 = vrot.slane %v62_v28, 1 }
 0x121   :  { %v76_v11 = vrot.slane %v75_v10, 4  ;;  %v243_v12 = vpop.xlane.xlu0 %242 }
 0x122   :  { %v244_v19 = vrot.slane %v243_v12, 4  ;;  %v212_v25 = vrot.slane %v211_v17, 2  ;;  %v64_v50 = vadd.f32 %v63_v38, %v62_v28 }
 0x123   :  { %v77_v15 = vadd.f32 %v76_v11, %v75_v10 }
 0x124   :  { %v36_v18 = vpop.xlane.xlu1 %35  ;;  %v245_v26 = vadd.f32 %v244_v19, %v243_v12  ;;  %v213_v39 = vadd.f32 %v212_v25, %v211_v17 }
 0x125   :  { %v78_v20 = vrot.slane %v77_v15, 2  ;;  %v37_v21 = vrot.slane %v36_v18, 4 }
 0x126   :  { %v246_v36 = vrot.slane %v245_v26, 2  ;;  %v214_v54 = vrot.slane %v213_v39, 1 }
 0x127   :  { %v38_v24 = vadd.f32 %v37_v21, %v36_v18  ;;  %v79_v31 = vadd.f32 %v78_v20, %v77_v15 }
 0x128   :  { %v188_v27 = vpop.xlane.xlu1 %187  ;;  %v247_v49 = vadd.f32 %v246_v36, %v245_v26  ;;  %v215_v60 = vadd.f32 %v214_v54, %v213_v39 }
 0x129   :  { %v39_v29 = vrot.slane %v38_v24, 2  ;;  %v189_v30 = vrot.slane %v188_v27, 4  ;;  %v80_v43 = vrot.slane %v79_v31, 1 }
 0x12a   :  { %v248_v59 = vrot.slane %v247_v49, 1 }
 0x12b   :  { %v190_v33 = vadd.f32 %v189_v30, %v188_v27  ;;  %v40_v34 = vadd.f32 %v39_v29, %v38_v24  ;;  %v81_v52 = vadd.f32 %v80_v43, %v79_v31 }
 0x12c   :  { %v226_v37 = vpop.xlane.xlu1 %225  ;;  %v249_v63 = vadd.f32 %v248_v59, %v247_v49 }
 0x12d   :  { %v191_v40 = vrot.slane %v190_v33, 2  ;;  %v227_v41 = vrot.slane %v226_v37, 4  ;;  %v41_v42 = vrot.slane %v40_v34, 1 }
 0x12f   :  { %v228_v45 = vadd.f32 %v227_v41, %v226_v37  ;;  %v42_v46 = vadd.f32 %v41_v42, %v40_v34  ;;  %v192_v48 = vadd.f32 %v191_v40, %v190_v33 }
 0x131   :  { %v229_v51 = vrot.slane %v228_v45, 2  ;;  %269 = vpush %v42_v46  ;;  %v193_v53 = vrot.slane %v192_v48, 1 }
 0x132   :  { %271 = vpush %v64_v50 }
 0x133   :  { %v230_v56 = vadd.f32 %v229_v51, %v228_v45  ;;  %273 = vpush %v81_v52  ;;  %v194_v58 = vadd.f32 %v193_v53, %v192_v48 }
 0x134   :  { %275 = vpush %v98_v55 }
 0x135   :  { %277 = vpush %v112_v57  ;;  %v231_v61 = vrot.slane %v230_v56, 1 }
 0x136   :  { %279 = vpush %v194_v58 }
 0x137   :  { %281 = vpush %v215_v60  ;;  %v232_v62 = vadd.f32 %v231_v61, %v230_v56 }
 0x139   :  { %283 = vpush %v232_v62 }
 0x13a   :  { %285 = vpush %v249_v63 }
 0x162   :  { %s270_s23 = spop %269 }
 0x163   :  { %s44_s24 = smul.f32 0.0013020834, %s270_s23  ;;  %s272_s25 = spop %271 }
 0x164   :  { %s66_s26 = smul.f32 0.001984127, %s272_s25  ;;  %s274_s27 = spop %273 }
 0x165   :  { %46 = sst [smem:[#allocation2]] %s44_s24  ;;  %s83_s28 = smul.f32 0.0026041667, %s274_s27 }
 0x166   :  { %68 = sst [smem:[#allocation2 + $0x1]] %s66_s26  ;;  %s276_s29 = spop %275 }
 0x167   :  { %85 = sst [smem:[#allocation2 + $0x2]] %s83_s28  ;;  %s100_s30 = smul.f32 0.0125, %s276_s29 }
 0x168   :  { %s278_s3 = spop %277 }
 0x169   :  { %102 = sst [smem:[#allocation2 + $0x3]] %s100_s30  ;;  %s114_s4 = smul.f32 0.0029761905, %s278_s3 }
 0x16a   :  { %s280_s5 = spop %279 }
 0x16b   :  { %116 = sst [smem:[#allocation2 + $0x4]] %s114_s4  ;;  %s196_s9 = smul.f32 0.0017361111, %s280_s5 }
 0x16c   :  { %s282_s10 = spop %281 }
 0x16d   :  { %198 = sst [smem:[#allocation2 + $0x5]] %s196_s9  ;;  %s217_s11 = smul.f32 0.0026455026, %s282_s10 }
 0x16e   :  { %s284_s12 = spop %283 }
 0x16f   :  { %219 = sst [smem:[#allocation2 + $0x6]] %s217_s11  ;;  %s234_s13 = smul.f32 0.0034722222, %s284_s12 }
 0x170   :  { %s286_s14 = spop %285 }
 0x171   :  { %236 = sst [smem:[#allocation2 + $0x7]] %s234_s13  ;;  %s251_s15 = smul.f32 0.016666668, %s286_s14 }
 0x173   :  { %253 = sst [smem:[#allocation2 + $0x8]] %s251_s15 }
 0x174   :  { %303 = shalt.err (!%p300_p4)
}
 0x175   :  { %s310_s2 = smov [#allocation2]  }
 0x176   :  { %263 = dma.smem_to_vmem %s310_s2, 16, %s261_s8, [#allocation3]  }
 0x177   :  { %304 = dma.done.wait [#allocation3], 16  }
 0x178   :  { %305 = vsyncadd [#allocation3], 4294967280 }
 0x179   :  { %267 = sfence }
 0x17a   :  { %268 = vsyncpa [#allocation3], 1 }

// kernel: train_step.2
= control target key start
LH: loop header
LB: loop body
LE: loop exit
PB: predicated region body
PF: predicated region fallthrough
CT: control target
= control target key end

     0   :  { %s2134_s24 = smov 0   ;;  %s2136_s25 = smov 0   ;;  %s2587_s0 = inlined_call_operand.vmem [shape: bf16[128,768], index: 0, kind: input, shape index: {}]   ;;  %s2588_s1 = inlined_call_operand.vmem [shape: bf16[128,128], index: 1, kind: input, shape index: {}]   ;;  %s2589_s2 = inlined_call_operand.vmem [shape: bf16[768,128], index: 2, kind: input, shape index: {}]   ;;  %s2590_s3 = inlined_call_operand.vmem [shape: bf16[128,128], index: 3, kind: input, shape index: {}]   ;;  %s2591_s4 = inlined_call_operand.vmem [shape: f32[1,128], index: 4, kind: input, shape index: {}]   ;;  %s2592_s5 = inlined_call_operand.vmem [shape: bf16[128,384], index: 5, kind: input, shape index: {}]   ;;  %s2593_s6 = inlined_call_operand.vmem [shape: f32[1,384], index: 6, kind: input, shape index: {}]   ;;  %s2594_s7 = inlined_call_operand.vmem [shape: f32[128,384], index: 7, kind: output, shape index: {}]  }
   0x1   :  { %s2138_s26 = smov 0   ;;  %s2140_s27 = smov 0  }
   0x2   :  { %s2142_s28 = smov 0  }
   0x3 LB: > { %s26_s29 = sadd.s32 1, %s2087_s27  ;;  %p45_p1 = scmp.ne.s32.totalorder %s2079_s25, %s2075_s24  ;;  %s2091_s28 = sphi %s2142_s28, %s17_s28   ;;  %s2087_s27 = sphi %s2140_s27, %s2598_s27   ;;  %s2083_s26 = sphi %s2138_s26, %s2597_s26   ;;  %s2079_s25 = sphi %s2136_s25, %s2596_s25   ;;  %s2075_s24 = sphi %s2134_s24, %s2595_s24  }
   0x4   : > { %p27_p0 = scmp.ge.s32.totalorder %s26_s29, 3  ;;  %p46_p2 = scmp.eq.s32.totalorder %s2091_s28, 0 }
   0x5   : > { %s38_s8 = sadd.s32 1, %s2079_s25  ;;  %p1644_p5 = scmp.ge.s32.totalorder %s2091_s28, 3 }
   0x6   : > { %s2600_s29 = smov (%p27_p0, %s26_s29), 0  ;;  %p47_p3 = por %p46_p2, %p45_p1 }
   0x7   : > { %s34_s30 = ssub.s32 %s2087_s27, %s2600_s29  ;;  %254 = sbr.rel (%p1644_p5) target bundleno = 26 (0x1a), region = 36 }
   0x8   : > { %p36_p4 = scmp.eq.s32.totalorder %s34_s30, 0 }
   0xa   : > { %s2169_s9 = scalar_select %p36_p4, %s2079_s25, %s38_s8  }
   0xe   : > { %257 = sbr.rel (!%p47_p3) target bundleno = 26 (0x1a), region = 40  ;;  %s259_s10 = sand.u32 (%p47_p3), 1, %s2079_s25  }
   0xf   : > { %s1731_s11 = sshll.u32 (%p47_p3), %s2087_s27, 3  ;;  %s1645_s12 = sshll.u32 (%p47_p3), %s259_s10, 7 }
  0x10   : > { %s2177_s15 = scalar_lea.vmem (%p47_p3), %s2587_s0, %s1731_s11  ;;  %s261_s16 = scalar_lea.vmem (%p47_p3), [#allocation3], %s1645_s12 }
  0x11   : > { %v325_v0 = vld [vmem:[%s2177_s15] sm:$0xff] (%p47_p3)  ;;  %v327_v1 = vld [vmem:[%s2177_s15 + $0x18] sm:$0xff] (%p47_p3)  ;;  %v329_v2 = vld [vmem:[%s2177_s15 + $0x30] sm:$0xff] (%p47_p3) }
  0x12   : > { %326 = vst [vmem:[%s261_s16] sm:$0xff] (%p47_p3), %v325_v0  ;;  %328 = vst [vmem:[%s261_s16 + $0x8] sm:$0xff] (%p47_p3), %v327_v1  ;;  %v331_v3 = vld [vmem:[%s2177_s15 + $0x48] sm:$0xff] (%p47_p3)  ;;  %v333_v4 = vld [vmem:[%s2177_s15 + $0x60] sm:$0xff] (%p47_p3) }
  0x13   : > { %330 = vst [vmem:[%s261_s16 + $0x10] sm:$0xff] (%p47_p3), %v329_v2  ;;  %v335_v5 = vld [vmem:[%s2177_s15 + $0x78] sm:$0xff] (%p47_p3)  ;;  %332 = vst [vmem:[%s261_s16 + $0x18] sm:$0xff] (%p47_p3), %v331_v3  ;;  %v337_v6 = vld [vmem:[%s2177_s15 + $0x90] sm:$0xff] (%p47_p3) }
  0x14   : > { %334 = vst [vmem:[%s261_s16 + $0x20] sm:$0xff] (%p47_p3), %v333_v4  ;;  %336 = vst [vmem:[%s261_s16 + $0x28] sm:$0xff] (%p47_p3), %v335_v5  ;;  %v339_v7 = vld [vmem:[%s2177_s15 + $0xa8] sm:$0xff] (%p47_p3)  ;;  %v341_v8 = vld [vmem:[%s2177_s15 + $0xc0] sm:$0xff] (%p47_p3) }
  0x15   : > { %338 = vst [vmem:[%s261_s16 + $0x30] sm:$0xff] %v337_v6  ;;  %340 = vst [vmem:[%s261_s16 + $0x38] sm:$0xff] %v339_v7  ;;  %v343_v9 = vld [vmem:[%s2177_s15 + $0xd8] sm:$0xff]  ;;  %v345_v10 = vld [vmem:[%s2177_s15 + $0xf0] sm:$0xff] }
  0x16   : > { %342 = vst [vmem:[%s261_s16 + $0x40] sm:$0xff] %v341_v8  ;;  %v347_v11 = vld [vmem:[%s2177_s15 + $0x108] sm:$0xff]  ;;  %344 = vst [vmem:[%s261_s16 + $0x48] sm:$0xff] %v343_v9  ;;  %v349_v12 = vld [vmem:[%s2177_s15 + $0x120] sm:$0xff] }
  0x17   : > { %346 = vst [vmem:[%s261_s16 + $0x50] sm:$0xff] %v345_v10  ;;  %348 = vst [vmem:[%s261_s16 + $0x58] sm:$0xff] %v347_v11  ;;  %v351_v13 = vld [vmem:[%s2177_s15 + $0x138] sm:$0xff]  ;;  %v353_v14 = vld [vmem:[%s2177_s15 + $0x150] sm:$0xff] }
  0x18   : > { %350 = vst [vmem:[%s261_s16 + $0x60] sm:$0xff] %v349_v12  ;;  %352 = vst [vmem:[%s261_s16 + $0x68] sm:$0xff] %v351_v13  ;;  %v355_v15 = vld [vmem:[%s2177_s15 + $0x168] sm:$0xff] }
  0x19   : > { %354 = vst [vmem:[%s261_s16 + $0x70] sm:$0xff] %v353_v14  ;;  %356 = vst [vmem:[%s261_s16 + $0x78] sm:$0xff] %v355_v15 }
  0x1a PF: > { %p1648_p6 = scmp.ge.s32.totalorder %s2091_s28, 1  ;;  %p370_p7 = scmp.lt.s32.totalorder %s2091_s28, 4 }
  0x1c   : > { %p371_p8 = pnand %p1648_p6, %p370_p7 }
  0x1d   : > { %s377_s17 = sand.u32 (!%p371_p8), 1, %s2075_s24   ;;  %s1650_s18 = sshll.u32 (!%p371_p8), %s2083_s26, 5 }
  0x1e   : > { %374 = sbr.rel (%p371_p8) target bundleno = 854 (0x356), region = 82  ;;  %s1649_s19 = sshll.u32 (!%p371_p8), %s377_s17, 7 }
  0x1f   : > { %p428_p9 = scmp.lt.s32.totalorder (!%p371_p8), %s1650_s18, 95  ;;  %s2204_s30 = scalar_lea.vmem (!%p371_p8), [#allocation3], %s1649_s19 }
  0x20   : > { %p1652_p10 = scmp.ne.s32.totalorder (!%p371_p8), %s2083_s26, 0 }
  0x25   : > { %s2602_s18 = smov (!%p428_p9, %s1650_s18), 95  ;;  %444 = sbr.rel (%p1652_p10) target bundleno = 297 (0x129), region = 90 }
  0x26   : > { %s1651_s20 = sshll.u32 %s2602_s18, 2  ;;  %v1965_v16 = vld [vmem:[%s2590_s3] sm:$0xff] (!%p1652_p10)   ;;  %v1966_v17 = vld [vmem:[%s2590_s3 + $0x8] sm:$0xff] (!%p1652_p10)   ;;  %v1967_v18 = vld [vmem:[%s2590_s3 + $0x10] sm:$0xff] (!%p1652_p10)  }
  0x27   : > { %s2202_s23 = scalar_lea.vmem %s2589_s2, %s1651_s20  ;;  %1828 = vmatprep.subr.bf16.mxu0 (!%p1652_p10), %v1965_v16  ;;  %1892 = vmatprep.subr.bf16.mxu1 (!%p1652_p10), %v1965_v16  ;;  %v1968_v19 = vld [vmem:[%s2590_s3 + $0x18] sm:$0xff] (!%p1652_p10)   ;;  %v1973_v20 = vld [vmem:[%s2588_s1] sm:$0xff] (!%p1652_p10)   ;;  %v1970_v23 = vld [vmem:[%s2590_s3 + $0x28] sm:$0xff] (!%p1652_p10)  }
  0x28   : > { %1829 = vmatpush3.bf16.msra.mxu0 (!%p1652_p10), %v1965_v16  ;;  %1900 = vmatpush3.bf16.msra.mxu1 (!%p1652_p10), %v1965_v16  ;;  %v1974_v21 = vld [vmem:[%s2588_s1 + $0x20] sm:$0xff] (!%p1652_p10)   ;;  %v1971_v24 = vld [vmem:[%s2590_s3 + $0x30] sm:$0xff] (!%p1652_p10)   ;;  %v1972_v25 = vld [vmem:[%s2590_s3 + $0x38] sm:$0xff] (!%p1652_p10)  }
  0x29   : > { %1830 = vmatprep.subr.bf16.mxu0 (!%p1652_p10), %v1966_v17  ;;  %1893 = vmatprep.subr.bf16.mxu1 (!%p1652_p10), %v1966_v17  ;;  %v1969_v22 = vld [vmem:[%s2590_s3 + $0x20] sm:$0xff] (!%p1652_p10)   ;;  %v1975_v26 = vld [vmem:[%s2588_s1 + $0x8] sm:$0xff] (!%p1652_p10)   ;;  %v1977_v28 = vld [vmem:[%s2588_s1 + $0x10] sm:$0xff] (!%p1652_p10)  }
  0x2a   : > { %1844 = vmatprep.mubr.bf16.mxu0 (!%p1652_p10), %v1973_v20  ;;  %1852 = vmatprep.mubr.bf16.mxu1 (!%p1652_p10), %v1974_v21  ;;  %v1976_v27 = vld [vmem:[%s2588_s1 + $0x28] sm:$0xff] (!%p1652_p10)   ;;  %v1978_v29 = vld [vmem:[%s2588_s1 + $0x30] sm:$0xff] (!%p1652_p10)   ;;  %v1979_v30 = vld [vmem:[%s2588_s1 + $0x18] sm:$0xff] (!%p1652_p10)  }
  0x2b   : > { %v1980_v31 = vld [vmem:[%s2588_s1 + $0x38] sm:$0xff] (!%p1652_p10)   ;;  %v1653_v32 = vld [vmem:[%s2591_s4] ss:$0 sm:$0xff] (!%p1652_p10) }
  0x2c   : > { %1831 = vmatpush3.bf16.msra.mxu0 %v1966_v17  ;;  %1901 = vmatpush3.bf16.msra.mxu1 %v1966_v17 }
  0x2d   : > { %1832 = vmatprep.subr.bf16.mxu0 %v1967_v18  ;;  %1894 = vmatprep.subr.bf16.mxu1 %v1967_v18 }
  0x30   : > { %1833 = vmatpush3.bf16.msra.mxu0 %v1967_v18  ;;  %1902 = vmatpush3.bf16.msra.mxu1 %v1967_v18 }
  0x31   : > { %1834 = vmatprep.subr.bf16.mxu0 %v1968_v19  ;;  %1895 = vmatprep.subr.bf16.mxu1 %v1968_v19 }
  0x34   : > { %1835 = vmatpush3.bf16.msra.mxu0 %v1968_v19  ;;  %1903 = vmatpush3.bf16.msra.mxu1 %v1968_v19 }
  0x35   : > { %1836 = vmatprep.subr.bf16.mxu0 %v1969_v22  ;;  %1896 = vmatprep.subr.bf16.mxu1 %v1969_v22 }
  0x38   : > { %1837 = vmatpush3.bf16.msra.mxu0 %v1969_v22  ;;  %1904 = vmatpush3.bf16.msra.mxu1 %v1969_v22 }
  0x39   : > { %1838 = vmatprep.subr.bf16.mxu0 %v1970_v23  ;;  %1897 = vmatprep.subr.bf16.mxu1 %v1970_v23 }
  0x3c   : > { %1839 = vmatpush3.bf16.msra.mxu0 %v1970_v23  ;;  %1905 = vmatpush3.bf16.msra.mxu1 %v1970_v23 }
  0x3d   : > { %1840 = vmatprep.subr.bf16.mxu0 %v1971_v24  ;;  %1898 = vmatprep.subr.bf16.mxu1 %v1971_v24 }
  0x40   : > { %1841 = vmatpush3.bf16.msra.mxu0 %v1971_v24  ;;  %1906 = vmatpush3.bf16.msra.mxu1 %v1971_v24 }
  0x41   : > { %1842 = vmatprep.subr.bf16.mxu0 %v1972_v25  ;;  %1899 = vmatprep.subr.bf16.mxu1 %v1972_v25 }
  0x44   : > { %1843 = vmatpush3.bf16.msra.mxu0 %v1972_v25  ;;  %1907 = vmatpush3.bf16.msra.mxu1 %v1972_v25 }
  0x47   : > { %1845 = vmatmul.mubr.bf16.vlgmr.msra.gmra.mrb[0].mxu0 %v1975_v26  ;;  %1853 = vmatmul.mubr.bf16.vlgmr.msra.gmra.mrb[0].mxu1 %v1976_v27 }
  0x48   : > { %1848 = vmatprep.mubr.bf16.mxu0 %v1977_v28  ;;  %1856 = vmatprep.mubr.bf16.mxu1 %v1978_v29 }
  0x4f   : > { %1849 = vmatmul.mubr.bf16.gmra.mrb[4].mxu0 %v1979_v30  ;;  %1857 = vmatmul.mubr.bf16.gmra.mrb[4].mxu1 %v1980_v31 }
 0x11a   : > { %v1846_v33 = vpop.f32.mrb[0].mxu0  ;;  %v1854_v34 = vpop.f32.mrb[0].mxu1 }
 0x11b   : > { %v623_v35 = vadd.f32 %v1846_v33, %v1653_v32  ;;  %v655_v36 = vadd.f32 %v1854_v34, %v1653_v32  ;;  %v614_v37 = vpop.f32.mrb[1].mxu0  ;;  %v646_v38 = vpop.f32.mrb[1].mxu1 }
 0x11c   : > { %v615_v39 = vadd.f32 %v1653_v32, %v614_v37  ;;  %v647_v40 = vadd.f32 %v1653_v32, %v646_v38  ;;  %v1847_v41 = vpop.f32.mrb[2].mxu0  ;;  %v1855_v42 = vpop.f32.mrb[2].mxu1 }
 0x11d   : > { %679 = vst [vmem:[#allocation2 + $0x10] sm:$0xff] %v623_v35  ;;  %687 = vst [vmem:[#allocation2 + $0x50] sm:$0xff] %v655_v36  ;;  %v626_v43 = vadd.f32 %v1847_v41, %v1653_v32  ;;  %v658_v44 = vadd.f32 %v1855_v42, %v1653_v32  ;;  %v617_v45 = vpop.f32.mrb[3].mxu0  ;;  %v649_v46 = vpop.f32.mrb[3].mxu1 }
 0x11e   : > { %677 = vst [vmem:[#allocation2] sm:$0xff] %v615_v39  ;;  %685 = vst [vmem:[#allocation2 + $0x40] sm:$0xff] %v647_v40  ;;  %v618_v47 = vadd.f32 %v1653_v32, %v617_v45  ;;  %v650_v48 = vadd.f32 %v1653_v32, %v649_v46 }
 0x11f   : > { %680 = vst [vmem:[#allocation2 + $0x18] sm:$0xff] %v626_v43  ;;  %688 = vst [vmem:[#allocation2 + $0x58] sm:$0xff] %v658_v44 }
 0x120   : > { %678 = vst [vmem:[#allocation2 + $0x8] sm:$0xff] %v618_v47  ;;  %686 = vst [vmem:[#allocation2 + $0x48] sm:$0xff] %v650_v48 }
 0x122   : > { %v1850_v49 = vpop.f32.mrb[4].mxu0  ;;  %v1858_v50 = vpop.f32.mrb[4].mxu1 }
 0x123   : > { %v639_v51 = vadd.f32 %v1850_v49, %v1653_v32  ;;  %v671_v52 = vadd.f32 %v1858_v50, %v1653_v32  ;;  %v630_v53 = vpop.f32.mrb[5].mxu0  ;;  %v662_v54 = vpop.f32.mrb[5].mxu1 }
 0x124   : > { %v631_v55 = vadd.f32 %v1653_v32, %v630_v53  ;;  %v663_v56 = vadd.f32 %v1653_v32, %v662_v54  ;;  %v1851_v57 = vpop.f32.mrb[6].mxu0  ;;  %v1859_v58 = vpop.f32.mrb[6].mxu1 }
 0x125   : > { %683 = vst [vmem:[#allocation2 + $0x30] sm:$0xff] %v639_v51  ;;  %691 = vst [vmem:[#allocation2 + $0x70] sm:$0xff] %v671_v52  ;;  %v642_v59 = vadd.f32 %v1851_v57, %v1653_v32  ;;  %v674_v60 = vadd.f32 %v1859_v58, %v1653_v32  ;;  %v633_v61 = vpop.f32.mrb[7].mxu0  ;;  %v665_v62 = vpop.f32.mrb[7].mxu1 }
 0x126   : > { %681 = vst [vmem:[#allocation2 + $0x20] sm:$0xff] %v631_v55  ;;  %689 = vst [vmem:[#allocation2 + $0x60] sm:$0xff] %v663_v56  ;;  %v634_v63 = vadd.f32 %v1653_v32, %v633_v61  ;;  %v666_v0 = vadd.f32 %v1653_v32, %v665_v62 }
 0x127   : > { %684 = vst [vmem:[#allocation2 + $0x38] sm:$0xff] %v642_v59  ;;  %692 = vst [vmem:[#allocation2 + $0x78] sm:$0xff] %v674_v60 }
 0x128   : > { %682 = vst [vmem:[#allocation2 + $0x28] sm:$0xff] %v634_v63  ;;  %690 = vst [vmem:[#allocation2 + $0x68] sm:$0xff] %v666_v0 }
 0x129 PF: > { %v1981_v1 = vld [vmem:[%s2202_s23 + $0x40] sm:$0xff]   ;;  %v1983_v3 = vld [vmem:[%s2202_s23 + $0x48] sm:$0xff]   ;;  %v1985_v5 = vld [vmem:[%s2202_s23 + $0x50] sm:$0xff]   ;;  %p1702_p11 = scmp.ne.s32.totalorder %s2083_s26, 2 }
 0x12a   : > { %v1982_v2 = vld [vmem:[%s2202_s23] sm:$0xff]   ;;  %1748 = vmatprep.subr.bf16.mxu0 %v1981_v1  ;;  %1908 = vmatprep.subr.bf16.mxu1 %v1981_v1  ;;  %v1984_v4 = vld [vmem:[%s2202_s23 + $0x8] sm:$0xff]   ;;  %v1986_v6 = vld [vmem:[%s2202_s23 + $0x10] sm:$0xff]  }
 0x12b   : > { %1749 = vmatpush3.bf16.msra.mxu0 %v1982_v2  ;;  %1916 = vmatpush3.bf16.msra.mxu1 %v1982_v2  ;;  %v1987_v7 = vld [vmem:[%s2202_s23 + $0x58] sm:$0xff]   ;;  %v1989_v9 = vld [vmem:[%s2202_s23 + $0x60] sm:$0xff]   ;;  %v1991_v11 = vld [vmem:[%s2202_s23 + $0x68] sm:$0xff]  }
 0x12c   : > { %1750 = vmatprep.subr.bf16.mxu0 %v1983_v3  ;;  %1909 = vmatprep.subr.bf16.mxu1 %v1983_v3  ;;  %v1988_v8 = vld [vmem:[%s2202_s23 + $0x18] sm:$0xff]   ;;  %v1990_v10 = vld [vmem:[%s2202_s23 + $0x20] sm:$0xff]   ;;  %v1992_v14 = vld [vmem:[%s2202_s23 + $0x28] sm:$0xff]  }
 0x12d   : > { %v1999_v12 = vld [vmem:[%s2204_s30 + $0x4] ss:$8 sps:$4 sm:$0xff]   ;;  %v1993_v15 = vld [vmem:[%s2202_s23 + $0x70] sm:$0xff]   ;;  %v1995_v17 = vld [vmem:[%s2202_s23 + $0x78] sm:$0xff]  }
 0x12e   : > { %v2002_v13 = vld [vmem:[%s2204_s30 + $0x44] ss:$8 sps:$4 sm:$0xff]   ;;  %965 = vmatprep.mubr.bf16.mxu0 %v1999_v12  ;;  %v1994_v16 = vld [vmem:[%s2202_s23 + $0x30] sm:$0xff]   ;;  %v1996_v18 = vld [vmem:[%s2202_s23 + $0x38] sm:$0xff]  }
 0x12f   : > { %1751 = vmatpush3.bf16.msra.mxu0 %v1984_v4  ;;  %1917 = vmatpush3.bf16.msra.mxu1 %v1984_v4  ;;  %v1997_v19 = vld [vmem:[%s2204_s30] ss:$8 sps:$4 sm:$0xff]   ;;  %v2003_v21 = vld [vmem:[%s2204_s30 + $0x14] ss:$8 sps:$4 sm:$0xff]   ;;  %v2007_v23 = vld [vmem:[%s2204_s30 + $0x10] ss:$8 sps:$4 sm:$0xff]  }
 0x130   : > { %1752 = vmatprep.subr.bf16.mxu0 %v1985_v5  ;;  %1910 = vmatprep.subr.bf16.mxu1 %v1985_v5  ;;  %v2000_v20 = vld [vmem:[%s2204_s30 + $0x40] ss:$8 sps:$4 sm:$0xff]   ;;  %v2005_v22 = vld [vmem:[%s2204_s30 + $0x54] ss:$8 sps:$4 sm:$0xff]   ;;  %v2008_v24 = vld [vmem:[%s2204_s30 + $0x50] ss:$8 sps:$4 sm:$0xff]  }
 0x131   : > { %997 = vmatprep.mubr.bf16.mxu1 %v2002_v13  ;;  %v2009_v25 = vld [vmem:[%s2204_s30 + $0x24] ss:$8 sps:$4 sm:$0xff]   ;;  %v2013_v27 = vld [vmem:[%s2204_s30 + $0x20] ss:$8 sps:$4 sm:$0xff]   ;;  %v2015_v29 = vld [vmem:[%s2204_s30 + $0x34] ss:$8 sps:$4 sm:$0xff]  }
 0x132   : > { %v2011_v26 = vld [vmem:[%s2204_s30 + $0x64] ss:$8 sps:$4 sm:$0xff]   ;;  %v2014_v28 = vld [vmem:[%s2204_s30 + $0x60] ss:$8 sps:$4 sm:$0xff]   ;;  %v2017_v30 = vld [vmem:[%s2204_s30 + $0x74] ss:$8 sps:$4 sm:$0xff]  }
 0x133   : > { %1753 = vmatpush3.bf16.msra.mxu0 %v1986_v6  ;;  %1918 = vmatpush3.bf16.msra.mxu1 %v1986_v6  ;;  %v2019_v31 = vld [vmem:[%s2204_s30 + $0x30] ss:$8 sps:$4 sm:$0xff]   ;;  %v693_v35 = vld [vmem:[#allocation2] sm:$0xff]  ;;  %v694_v43 = vld [vmem:[#allocation2 + $0x8] sm:$0xff] }
 0x134   : > { %1754 = vmatprep.subr.bf16.mxu0 %v1987_v7  ;;  %1911 = vmatprep.subr.bf16.mxu1 %v1987_v7  ;;  %v2020_v32 = vld [vmem:[%s2204_s30 + $0x70] ss:$8 sps:$4 sm:$0xff]   ;;  %v701_v37 = vld [vmem:[#allocation2 + $0x40] sm:$0xff]  ;;  %v702_v45 = vld [vmem:[#allocation2 + $0x48] sm:$0xff] }
 0x135   : > { %v695_v55 = vld [vmem:[#allocation2 + $0x10] sm:$0xff]  ;;  %v696_v63 = vld [vmem:[#allocation2 + $0x18] sm:$0xff]  ;;  %v705_v13 = vld [vmem:[#allocation2 + $0x60] sm:$0xff] }
 0x136   : > { %v703_v57 = vld [vmem:[#allocation2 + $0x50] sm:$0xff]  ;;  %v704_v1 = vld [vmem:[#allocation2 + $0x58] sm:$0xff] }
 0x137   : > { %1755 = vmatpush3.bf16.msra.mxu0 %v1988_v8  ;;  %1919 = vmatpush3.bf16.msra.mxu1 %v1988_v8 }
 0x138   : > { %1756 = vmatprep.subr.bf16.mxu0 %v1989_v9  ;;  %1912 = vmatprep.subr.bf16.mxu1 %v1989_v9 }
 0x13b   : > { %1757 = vmatpush3.bf16.msra.mxu0 %v1990_v10  ;;  %1920 = vmatpush3.bf16.msra.mxu1 %v1990_v10 }
 0x13c   : > { %1758 = vmatprep.subr.bf16.mxu0 %v1991_v11  ;;  %1913 = vmatprep.subr.bf16.mxu1 %v1991_v11  ;;  %v697_v11 = vld [vmem:[#allocation2 + $0x20] sm:$0xff] }
 0x13f   : > { %1759 = vmatpush3.bf16.msra.mxu0 %v1992_v14  ;;  %1921 = vmatpush3.bf16.msra.mxu1 %v1992_v14 }
 0x140   : > { %1760 = vmatprep.subr.bf16.mxu0 %v1993_v15  ;;  %1914 = vmatprep.subr.bf16.mxu1 %v1993_v15 }
 0x143   : > { %1761 = vmatpush3.bf16.msra.mxu0 %v1994_v16  ;;  %1922 = vmatpush3.bf16.msra.mxu1 %v1994_v16 }
 0x144   : > { %1762 = vmatprep.subr.bf16.mxu0 %v1995_v17  ;;  %1915 = vmatprep.subr.bf16.mxu1 %v1995_v17 }
 0x147   : > { %1763 = vmatpush3.bf16.msra.mxu0 %v1996_v18  ;;  %1923 = vmatpush3.bf16.msra.mxu1 %v1996_v18 }
 0x14a   : > { %966 = vmatmul.mubr.bf16.vlgmr.msra.gmra.mrb[0].mxu0 %v1997_v19  ;;  %998 = vmatmul.mubr.bf16.vlgmr.msra.gmra.mrb[0].mxu1 %v2000_v20  ;;  %v698_v19 = vld [vmem:[#allocation2 + $0x28] sm:$0xff] }
 0x14b   : > { %973 = vmatprep.mubr.bf16.mxu0 %v2003_v21  ;;  %1005 = vmatprep.mubr.bf16.mxu1 %v2005_v22  ;;  %v706_v21 = vld [vmem:[#allocation2 + $0x68] sm:$0xff] }
 0x152   : > { %974 = vmatmul.mubr.bf16.gmra.mrb[4].mxu0 %v2007_v23  ;;  %1006 = vmatmul.mubr.bf16.gmra.mrb[4].mxu1 %v2008_v24 }
 0x153   : > { %981 = vmatprep.mubr.bf16.mxu0 %v2009_v25  ;;  %1013 = vmatprep.mubr.bf16.mxu1 %v2011_v26 }
 0x15a   : > { %982 = vmatmul.mubr.bf16.gmra.mrb[8].mxu0 %v2013_v27  ;;  %1014 = vmatmul.mubr.bf16.gmra.mrb[8].mxu1 %v2014_v28 }
 0x15b   : > { %989 = vmatprep.mubr.bf16.mxu0 %v2015_v29  ;;  %1021 = vmatprep.mubr.bf16.mxu1 %v2017_v30 }
 0x162   : > { %990 = vmatmul.mubr.bf16.gmra.mrb[12].mxu0 %v2019_v31  ;;  %1022 = vmatmul.mubr.bf16.gmra.mrb[12].mxu1 %v2020_v32  ;;  %v699_v31 = vld [vmem:[#allocation2 + $0x30] sm:$0xff] }
 0x21d   : > { %v1764_v33 = vpop.f32.mrb[0].mxu0  ;;  %v1788_v34 = vpop.f32.mrb[0].mxu1 }
 0x21e   : > { %v1765_v36 = vpop.f32.mrb[1].mxu0  ;;  %v1789_v38 = vpop.f32.mrb[1].mxu1 }
 0x21f   : > { %v1766_v39 = vadd.f32 %v1765_v36, %v1764_v33  ;;  %v1790_v40 = vadd.f32 %v1789_v38, %v1788_v34  ;;  %v1767_v41 = vpop.f32.mrb[2].mxu0  ;;  %v1791_v42 = vpop.f32.mrb[2].mxu1  ;;  %v707_v33 = vld [vmem:[#allocation2 + $0x70] sm:$0xff] }
 0x220   : > { %v1768_v44 = vpop.f32.mrb[3].mxu0  ;;  %v1792_v46 = vpop.f32.mrb[3].mxu1 }
 0x221   : > { %v1030_v47 = vadd.f32 %v1766_v39, %v693_v35  ;;  %v1038_v48 = vadd.f32 %v1790_v40, %v701_v37  ;;  %v1769_v49 = vadd.f32 %v1768_v44, %v1767_v41  ;;  %v1793_v50 = vadd.f32 %v1792_v46, %v1791_v42  ;;  %v700_v39 = vld [vmem:[#allocation2 + $0x38] sm:$0xff] }
 0x222   : > { %v708_v41 = vld [vmem:[#allocation2 + $0x78] sm:$0xff] }
 0x223   : > { %1046 = vst [vmem:[#allocation2] sm:$0xff] %v1030_v47  ;;  %1054 = vst [vmem:[#allocation2 + $0x40] sm:$0xff] %v1038_v48  ;;  %v1031_v51 = vadd.f32 %v1769_v49, %v694_v43  ;;  %v1039_v52 = vadd.f32 %v1793_v50, %v702_v45  ;;  %v2021_v49 = vld [vmem:[%s2592_s5 + $0x4] ss:$12 sps:$4 sm:$0xff] (!%p1702_p11)   ;;  %v2023_v50 = vld [vmem:[%s2592_s5] ss:$12 sps:$4 sm:$0xff] (!%p1702_p11)  }
 0x224   : > { %1283 = vmatprep.subr.bf16.mxu0 (!%p1702_p11), %v2021_v49 }
 0x225   : > { %1047 = vst [vmem:[#allocation2 + $0x8] sm:$0xff] %v1031_v51  ;;  %1055 = vst [vmem:[#allocation2 + $0x48] sm:$0xff] %v1039_v52  ;;  %v1770_v53 = vpop.f32.mrb[4].mxu0  ;;  %v1794_v54 = vpop.f32.mrb[4].mxu1  ;;  %v2093_v51 = vmov (!%p1702_p11), 0   ;;  %1284 = vmatpush1.bf16.msra.mxu0 (!%p1702_p11), %v2023_v50  ;;  %v1140_v50 = vlaneseq (!%p1702_p11) }
 0x226   : > { %v1771_v56 = vpop.f32.mrb[5].mxu0  ;;  %v1795_v58 = vpop.f32.mrb[5].mxu1  ;;  %1315 = vmatprep.mubr.bf16.mxu0 (!%p1702_p11), %v2093_v51  ;;  %v2024_v52 = vld [vmem:[%s2592_s5 + $0x1c] ss:$12 sps:$4 sm:$0xff] (!%p1702_p11)  }
 0x227   : > { %v1772_v59 = vadd.f32 %v1771_v56, %v1770_v53  ;;  %v1796_v60 = vadd.f32 %v1795_v58, %v1794_v54  ;;  %v1773_v61 = vpop.f32.mrb[6].mxu0  ;;  %v1797_v62 = vpop.f32.mrb[6].mxu1  ;;  %v2026_v53 = vld [vmem:[%s2592_s5 + $0x18] ss:$12 sps:$4 sm:$0xff] (!%p1702_p11)   ;;  %1285 = vmatprep.subr.bf16.mxu0 (!%p1702_p11), %v2024_v52  ;;  %v2027_v54 = vld [vmem:[%s2592_s5 + $0x34] ss:$12 sps:$4 sm:$0xff] (!%p1702_p11)  }
 0x228   : > { %v1774_v0 = vpop.f32.mrb[7].mxu0  ;;  %v1798_v2 = vpop.f32.mrb[7].mxu1  ;;  %v2030_v56 = vld [vmem:[%s2592_s5 + $0x4c] ss:$12 sps:$4 sm:$0xff] (!%p1702_p11)   ;;  %v2033_v58 = vld [vmem:[%s2592_s5 + $0x64] ss:$12 sps:$4 sm:$0xff] (!%p1702_p11)  }
 0x229   : > { %v1032_v3 = vadd.f32 %v1772_v59, %v695_v55  ;;  %v1040_v4 = vadd.f32 %v1796_v60, %v703_v57  ;;  %v1775_v5 = vadd.f32 %v1774_v0, %v1773_v61  ;;  %v1799_v6 = vadd.f32 %v1798_v2, %v1797_v62  ;;  %1286 = vmatpush1.bf16.msra.mxu0 (!%p1702_p11), %v2026_v53  ;;  %v2029_v55 = vld [vmem:[%s2592_s5 + $0x30] ss:$12 sps:$4 sm:$0xff] (!%p1702_p11)   ;;  %v2032_v57 = vld [vmem:[%s2592_s5 + $0x48] ss:$12 sps:$4 sm:$0xff] (!%p1702_p11)   ;;  %v2046_v0 = vld [vmem:[%s2592_s5 + $0x20] ss:$12 sps:$4 sm:$0xff] (!%p1702_p11)  }
 0x22a   : > { %1287 = vmatprep.subr.bf16.mxu0 (!%p1702_p11), %v2027_v54  ;;  %v2045_v59 = vld [vmem:[%s2592_s5 + $0x8] ss:$12 sps:$4 sm:$0xff] (!%p1702_p11)   ;;  %v1066_v60 = vld [vmem:[#allocation2] sm:$0xff] (!%p1702_p11)  ;;  %v1141_v52 = vshrl.u32 (!%p1702_p11), %v1140_v50, 7 }
 0x22b   : > { %1048 = vst [vmem:[#allocation2 + $0x10] sm:$0xff] %v1032_v3  ;;  %1056 = vst [vmem:[#allocation2 + $0x50] sm:$0xff] %v1040_v4  ;;  %v1033_v7 = vadd.f32 %v1775_v5, %v696_v63  ;;  %v1041_v8 = vadd.f32 %v1799_v6, %v704_v1  ;;  %v1082_v62 = vmax.f32 (!%p1702_p11), %v1066_v60, 0.0  ;;  %1860 = vmatprep.subr.bf16.mxu1 (!%p1702_p11), %v2045_v59  ;;  %v2035_v1 = vld [vmem:[%s2592_s5 + $0x60] ss:$12 sps:$4 sm:$0xff] (!%p1702_p11)  }
 0x22c   : > { %v1067_v61 = vld [vmem:[#allocation2 + $0x8] sm:$0xff] (!%p1702_p11)  ;;  %1861 = vmatpush3.bf16.msra.mxu1 (!%p1702_p11), %v2045_v59  ;;  %v2047_v3 = vld [vmem:[%s2592_s5 + $0x38] ss:$12 sps:$4 sm:$0xff] (!%p1702_p11)   ;;  %v2048_v6 = vld [vmem:[%s2592_s5 + $0x50] ss:$12 sps:$4 sm:$0xff] (!%p1702_p11)   ;;  %v1142_v53 = vsub.s32 (!%p1702_p11), 0, %v1141_v52 }
 0x22d   : > { %1049 = vst [vmem:[#allocation2 + $0x18] sm:$0xff] %v1033_v7  ;;  %1057 = vst [vmem:[#allocation2 + $0x58] sm:$0xff] %v1041_v8  ;;  %v1776_v9 = vpop.f32.mrb[8].mxu0  ;;  %v1800_v10 = vpop.f32.mrb[8].mxu1  ;;  %1288 = vmatpush1.bf16.msra.mxu0 (!%p1702_p11), %v2029_v55  ;;  %v1083_v63 = vmax.f32 (!%p1702_p11), %v1067_v61, 0.0  ;;  %1862 = vmatprep.subr.bf16.mxu1 (!%p1702_p11), %v2046_v0  ;;  %v1146_v55 = vsub.s32 (!%p1702_p11), 1, %v1141_v52 }
 0x22e   : > { %v1777_v12 = vpop.f32.mrb[9].mxu0  ;;  %v1801_v14 = vpop.f32.mrb[9].mxu1  ;;  %1289 = vmatprep.subr.bf16.mxu0 (!%p1702_p11), %v2030_v56  ;;  %v2036_v4 = vld [vmem:[%s2592_s5 + $0x7c] ss:$12 sps:$4 sm:$0xff] (!%p1702_p11)   ;;  %v2038_v5 = vld [vmem:[%s2592_s5 + $0x78] ss:$12 sps:$4 sm:$0xff] (!%p1702_p11)  }
 0x22f   : > { %v1778_v15 = vadd.f32 %v1777_v12, %v1776_v9  ;;  %v1802_v16 = vadd.f32 %v1801_v14, %v1800_v10  ;;  %v1779_v17 = vpop.f32.mrb[10].mxu0  ;;  %v1803_v18 = vpop.f32.mrb[10].mxu1  ;;  %v1098_v2 = vpack.c.bf16 (!%p1702_p11), %v1083_v63, %v1082_v62  ;;  %v2039_v7 = vld [vmem:[%s2592_s5 + $0x94] ss:$12 sps:$4 sm:$0xff] (!%p1702_p11)   ;;  %v2041_v8 = vld [vmem:[%s2592_s5 + $0x90] ss:$12 sps:$4 sm:$0xff] (!%p1702_p11)  }
 0x230   : > { %v1780_v20 = vpop.f32.mrb[11].mxu0  ;;  %v1804_v22 = vpop.f32.mrb[11].mxu1  ;;  %1863 = vmatpush3.bf16.msra.mxu1 (!%p1702_p11), %v2046_v0  ;;  %v2049_v9 = vld [vmem:[%s2592_s5 + $0x68] ss:$12 sps:$4 sm:$0xff] (!%p1702_p11)   ;;  %v2042_v10 = vld [vmem:[%s2592_s5 + $0xac] ss:$12 sps:$4 sm:$0xff] (!%p1702_p11)  }
 0x231   : > { %v1034_v23 = vadd.f32 %v1778_v15, %v697_v11  ;;  %v1042_v24 = vadd.f32 %v1802_v16, %v705_v13  ;;  %v1781_v25 = vadd.f32 %v1780_v20, %v1779_v17  ;;  %v1805_v26 = vadd.f32 %v1804_v22, %v1803_v18  ;;  %1290 = vmatpush1.bf16.msra.mxu0 (!%p1702_p11), %v2032_v57  ;;  %v2044_v11 = vld [vmem:[%s2592_s5 + $0xa8] ss:$12 sps:$4 sm:$0xff] (!%p1702_p11)   ;;  %v2050_v12 = vld [vmem:[%s2592_s5 + $0x80] ss:$12 sps:$4 sm:$0xff] (!%p1702_p11)   ;;  %v2051_v15 = vld [vmem:[%s2592_s5 + $0x98] ss:$12 sps:$4 sm:$0xff] (!%p1702_p11)  }
 0x232   : > { %1291 = vmatprep.subr.bf16.mxu0 (!%p1702_p11), %v2033_v58  ;;  %1876 = vmatprep.mubr.bf16.mxu1 (!%p1702_p11), %v1098_v2  ;;  %v1068_v13 = vld [vmem:[#allocation2 + $0x10] sm:$0xff] (!%p1702_p11)  ;;  %v1138_v54 = vld [vmem:[%s2593_s6] sm:$0x7] (!%p1702_p11) }
 0x233   : > { %1050 = vst [vmem:[#allocation2 + $0x20] sm:$0xff] %v1034_v23  ;;  %1058 = vst [vmem:[#allocation2 + $0x60] sm:$0xff] %v1042_v24  ;;  %v1035_v27 = vadd.f32 %v1781_v25, %v698_v19  ;;  %v1043_v28 = vadd.f32 %v1805_v26, %v706_v21  ;;  %1864 = vmatprep.subr.bf16.mxu1 (!%p1702_p11), %v2047_v3  ;;  %v1084_v16 = vmax.f32 (!%p1702_p11), %v1068_v13, 0.0  ;;  %v2052_v18 = vld [vmem:[%s2592_s5 + $0xb0] ss:$12 sps:$4 sm:$0xff] (!%p1702_p11)  }
 0x234   : > { %1865 = vmatpush3.bf16.msra.mxu1 (!%p1702_p11), %v2047_v3  ;;  %v1069_v14 = vld [vmem:[#allocation2 + $0x18] sm:$0xff] (!%p1702_p11)  ;;  %v2374_v56 = vrot.slane (!%p1702_p11), %v1138_v54, %v1142_v53  ;;  %v2376_v57 = vrot.slane (!%p1702_p11), %v1138_v54, %v1146_v55 }
 0x235   : > { %1051 = vst [vmem:[#allocation2 + $0x28] sm:$0xff] %v1035_v27  ;;  %1059 = vst [vmem:[#allocation2 + $0x68] sm:$0xff] %v1043_v28  ;;  %v1782_v29 = vpop.f32.mrb[12].mxu0  ;;  %v1806_v30 = vpop.f32.mrb[12].mxu1  ;;  %1292 = vmatpush1.bf16.msra.mxu0 (!%p1702_p11), %v2035_v1  ;;  %1866 = vmatprep.subr.bf16.mxu1 (!%p1702_p11), %v2048_v6  ;;  %v1085_v17 = vmax.f32 (!%p1702_p11), %v1069_v14, 0.0  ;;  %v1074_v27 = vld [vmem:[#allocation2 + $0x40] sm:$0xff] (!%p1702_p11) }
 0x236   : > { %v1783_v32 = vpop.f32.mrb[13].mxu0  ;;  %v1807_v34 = vpop.f32.mrb[13].mxu1  ;;  %1293 = vmatprep.subr.bf16.mxu0 (!%p1702_p11), %v2036_v4  ;;  %v1075_v28 = vld [vmem:[#allocation2 + $0x48] sm:$0xff] (!%p1702_p11)  ;;  %v1150_v1 = vsub.s32 (!%p1702_p11), 2, %v1141_v52 }
 0x237   : > { %v1784_v35 = vadd.f32 %v1783_v32, %v1782_v29  ;;  %v1808_v36 = vadd.f32 %v1807_v34, %v1806_v30  ;;  %v1785_v37 = vpop.f32.mrb[14].mxu0  ;;  %v1809_v38 = vpop.f32.mrb[14].mxu1  ;;  %1065 = sbr.rel (%p1702_p11) target bundleno = 854 (0x356), region = 94  ;;  %v1099_v21 = vpack.c.bf16 (!%p1702_p11), %v1085_v17, %v1084_v16  ;;  %v1091_v32 = vmax.f32 (!%p1702_p11), %v1075_v28, 0.0 }
 0x238   : > { %v1786_v40 = vpop.f32.mrb[15].mxu0  ;;  %v1810_v42 = vpop.f32.mrb[15].mxu1  ;;  %1867 = vmatpush3.bf16.msra.mxu1 (!%p1702_p11), %v2048_v6  ;;  %v2394_v3 = vrot.slane (!%p1702_p11), %v1138_v54, %v1150_v1 }
 0x239   : > { %v1036_v43 = vadd.f32 %v1784_v35, %v699_v31  ;;  %v1044_v44 = vadd.f32 %v1808_v36, %v707_v33  ;;  %v1787_v45 = vadd.f32 %v1786_v40, %v1785_v37  ;;  %v1811_v46 = vadd.f32 %v1810_v42, %v1809_v38  ;;  %1294 = vmatpush1.bf16.msra.mxu0 (!%p1702_p11), %v2038_v5  ;;  %v1076_v35 = vld [vmem:[#allocation2 + $0x50] sm:$0xff] (!%p1702_p11)  ;;  %v1077_v36 = vld [vmem:[#allocation2 + $0x58] sm:$0xff] (!%p1702_p11) }
 0x23a   : > { %1295 = vmatprep.subr.bf16.mxu0 (!%p1702_p11), %v2039_v7  ;;  %1868 = vmatprep.subr.bf16.mxu1 (!%p1702_p11), %v2049_v9  ;;  %v1070_v19 = vld [vmem:[#allocation2 + $0x20] sm:$0xff] (!%p1702_p11)  ;;  %v1090_v31 = vmax.f32 (!%p1702_p11), %v1074_v27, 0.0  ;;  %v1093_v40 = vmax.f32 (!%p1702_p11), %v1077_v36, 0.0 }
 0x23b   : > { %1052 = vst [vmem:[#allocation2 + $0x30] sm:$0xff] %v1036_v43  ;;  %1060 = vst [vmem:[#allocation2 + $0x70] sm:$0xff] %v1044_v44  ;;  %v1037_v47 = vadd.f32 %v1787_v45, %v700_v39  ;;  %v1045_v48 = vadd.f32 %v1811_v46, %v708_v41  ;;  %v1086_v22 = vmax.f32 (!%p1702_p11), %v1070_v19, 0.0  ;;  %v1078_v37 = vld [vmem:[#allocation2 + $0x60] sm:$0xff] (!%p1702_p11)  ;;  %v1092_v39 = vmax.f32 (!%p1702_p11), %v1076_v35, 0.0 }
 0x23c   : > { %1869 = vmatpush3.bf16.msra.mxu1 (!%p1702_p11), %v2049_v9  ;;  %v1071_v20 = vld [vmem:[#allocation2 + $0x28] sm:$0xff] (!%p1702_p11)  ;;  %v1102_v34 = vpack.c.bf16 (!%p1702_p11), %v1091_v32, %v1090_v31  ;;  %v1094_v41 = vmax.f32 (!%p1702_p11), %v1078_v37, 0.0 }
 0x23d   : > { %1053 = vst [vmem:[#allocation2 + $0x38] sm:$0xff] %v1037_v47  ;;  %1061 = vst [vmem:[#allocation2 + $0x78] sm:$0xff] %v1045_v48  ;;  %1296 = vmatpush1.bf16.msra.mxu0 (!%p1702_p11), %v2041_v8  ;;  %1870 = vmatprep.subr.bf16.mxu1 (!%p1702_p11), %v2050_v12  ;;  %v1087_v23 = vmax.f32 (!%p1702_p11), %v1071_v20, 0.0  ;;  %v1079_v38 = vld [vmem:[#allocation2 + $0x68] sm:$0xff] (!%p1702_p11)  ;;  %v1103_v45 = vpack.c.bf16 (!%p1702_p11), %v1093_v40, %v1092_v39 }
 0x23e   : > { %1297 = vmatprep.subr.bf16.mxu0 %v2042_v10  ;;  %v1095_v42 = vmax.f32 %v1079_v38, 0.0 }
 0x23f   : > { %v1100_v24 = vpack.c.bf16 %v1087_v23, %v1086_v22 }
 0x240   : > { %1871 = vmatpush3.bf16.msra.mxu1 %v2050_v12  ;;  %v1104_v46 = vpack.c.bf16 %v1095_v42, %v1094_v41 }
 0x241   : > { %1298 = vmatpush1.bf16.msra.mxu0 %v2044_v11  ;;  %1872 = vmatprep.subr.bf16.mxu1 %v2051_v15 }
 0x242   : > { %v1072_v25 = vld [vmem:[#allocation2 + $0x30] sm:$0xff] }
 0x243   : > { %v1088_v29 = vmax.f32 %v1072_v25, 0.0  ;;  %v1080_v43 = vld [vmem:[#allocation2 + $0x70] sm:$0xff] }
 0x244   : > { %1316 = vmatmul.mubr.bf16.vlgmr.msra.gmra.mrb[0].mxu0 %v1098_v2  ;;  %1873 = vmatpush3.bf16.msra.mxu1 %v2051_v15  ;;  %v1073_v26 = vld [vmem:[#allocation2 + $0x38] sm:$0xff]  ;;  %v1096_v47 = vmax.f32 %v1080_v43, 0.0 }
 0x245   : > { %1325 = vmatprep.mubr.bf16.mxu0 %v2093_v51  ;;  %1874 = vmatprep.subr.bf16.mxu1 %v2052_v18  ;;  %v1089_v30 = vmax.f32 %v1073_v26, 0.0  ;;  %v1081_v44 = vld [vmem:[#allocation2 + $0x78] sm:$0xff] }
 0x246   : > { %v1097_v48 = vmax.f32 %v1081_v44, 0.0 }
 0x247   : > { %v1101_v33 = vpack.c.bf16 %v1089_v30, %v1088_v29 }
 0x248   : > { %1875 = vmatpush3.bf16.msra.mxu1 %v2052_v18  ;;  %v1105_v49 = vpack.c.bf16 %v1097_v48, %v1096_v47 }
 0x24b   : > { %1877 = vmatmul.mubr.bf16.vlgmr.msra.gmra.mrb[0].mxu1 %v1099_v21 }
 0x24c   : > { %1326 = vmatmul.mubr.bf16.gmra.mrb[4].mxu0 %v1099_v21  ;;  %1880 = vmatprep.mubr.bf16.mxu1 %v1100_v24 }
 0x24d   : > { %1335 = vmatprep.mubr.bf16.mxu0 %v2093_v51 }
 0x253   : > { %1881 = vmatmul.mubr.bf16.gmra.mrb[4].mxu1 %v1101_v33 }
 0x254   : > { %1336 = vmatmul.mubr.bf16.gmra.mrb[8].mxu0 %v1100_v24  ;;  %1884 = vmatprep.mubr.bf16.mxu1 %v1102_v34 }
 0x255   : > { %1345 = vmatprep.mubr.bf16.mxu0 %v2093_v51 }
 0x25b   : > { %1885 = vmatmul.mubr.bf16.gmra.mrb[8].mxu1 %v1103_v45 }
 0x25c   : > { %1346 = vmatmul.mubr.bf16.gmra.mrb[12].mxu0 %v1101_v33  ;;  %1888 = vmatprep.mubr.bf16.mxu1 %v1104_v46 }
 0x25d   : > { %1355 = vmatprep.mubr.bf16.mxu0 %v2093_v51 }
 0x263   : > { %1889 = vmatmul.mubr.bf16.gmra.mrb[12].mxu1 %v1105_v49 }
 0x264   : > { %1356 = vmatmul.mubr.bf16.gmra.mrb[16].mxu0 %v1102_v34 }
 0x265   : > { %1365 = vmatprep.mubr.bf16.mxu0 %v2093_v51 }
 0x26c   : > { %1366 = vmatmul.mubr.bf16.gmra.mrb[20].mxu0 %v1103_v45 }
 0x26d   : > { %1375 = vmatprep.mubr.bf16.mxu0 %v2093_v51 }
 0x274   : > { %1376 = vmatmul.mubr.bf16.gmra.mrb[24].mxu0 %v1104_v46 }
 0x275   : > { %1385 = vmatprep.mubr.bf16.mxu0 %v2093_v51 }
 0x27c   : > { %1386 = vmatmul.mubr.bf16.gmra.mrb[28].mxu0 %v1105_v49 }
 0x317   : > { %v1317_v58 = vpop.f32.mrb[0].mxu0 }
 0x318   : > { %v1318_v59 = vadd.f32 %v1317_v58, %v2374_v56  ;;  %v1319_v60 = vpop.f32.mrb[1].mxu0 }
 0x319   : > { %v1320_v61 = vadd.f32 %v1319_v60, %v2376_v57  ;;  %v1321_v51 = vpop.f32.mrb[2].mxu0 }
 0x31a   : > { %1493 = vst [vmem:[%s2594_s7] sm:$0xff] %v1318_v59  ;;  %v1322_v62 = vadd.f32 %v1321_v51, %v2374_v56  ;;  %v1323_v63 = vpop.f32.mrb[3].mxu0 }
 0x31b   : > { %1494 = vst [vmem:[%s2594_s7 + $0x8] sm:$0xff] %v1320_v61  ;;  %v1324_v0 = vadd.f32 %v1323_v63, %v2376_v57 }
 0x31c   : > { %1496 = vst [vmem:[%s2594_s7 + $0x18] sm:$0xff] %v1322_v62 }
 0x31d   : > { %1497 = vst [vmem:[%s2594_s7 + $0x20] sm:$0xff] %v1324_v0 }
 0x31e   : > { %v1878_v10 = vpop.f32.mrb[0].mxu1 }
 0x31f   : > { %v1327_v2 = vpop.f32.mrb[4].mxu0  ;;  %v1439_v12 = vadd.f32 %v1878_v10, %v2394_v3  ;;  %v1430_v13 = vpop.f32.mrb[1].mxu1 }
 0x320   : > { %v1328_v4 = vadd.f32 %v1327_v2, %v2374_v56  ;;  %v1329_v5 = vpop.f32.mrb[5].mxu0  ;;  %v1431_v14 = vadd.f32 %v1430_v13, %v2394_v3  ;;  %v1879_v15 = vpop.f32.mrb[2].mxu1 }
 0x321   : > { %v1330_v6 = vadd.f32 %v1329_v5, %v2376_v57  ;;  %v1331_v7 = vpop.f32.mrb[6].mxu0  ;;  %1501 = vst [vmem:[%s2594_s7 + $0x40] sm:$0xff] %v1439_v12  ;;  %v1442_v16 = vadd.f32 %v1879_v15, %v2394_v3  ;;  %v1433_v17 = vpop.f32.mrb[3].mxu1 }
 0x322   : > { %1499 = vst [vmem:[%s2594_s7 + $0x30] sm:$0xff] %v1328_v4  ;;  %v1332_v8 = vadd.f32 %v1331_v7, %v2374_v56  ;;  %v1333_v9 = vpop.f32.mrb[7].mxu0  ;;  %1495 = vst [vmem:[%s2594_s7 + $0x10] sm:$0xff] %v1431_v14  ;;  %v1434_v18 = vadd.f32 %v1433_v17, %v2394_v3 }
 0x323   : > { %1500 = vst [vmem:[%s2594_s7 + $0x38] sm:$0xff] %v1330_v6  ;;  %v1334_v11 = vadd.f32 %v1333_v9, %v2376_v57  ;;  %1504 = vst [vmem:[%s2594_s7 + $0x58] sm:$0xff] %v1442_v16 }
 0x324   : > { %1502 = vst [vmem:[%s2594_s7 + $0x48] sm:$0xff] %v1332_v8  ;;  %1498 = vst [vmem:[%s2594_s7 + $0x28] sm:$0xff] %v1434_v18 }
 0x325   : > { %1503 = vst [vmem:[%s2594_s7 + $0x50] sm:$0xff] %v1334_v11 }
 0x326   : > { %v1882_v26 = vpop.f32.mrb[4].mxu1 }
 0x327   : > { %v1337_v19 = vpop.f32.mrb[8].mxu0  ;;  %v1455_v28 = vadd.f32 %v1882_v26, %v2394_v3  ;;  %v1446_v29 = vpop.f32.mrb[5].mxu1 }
 0x328   : > { %v1338_v20 = vadd.f32 %v1337_v19, %v2374_v56  ;;  %v1339_v21 = vpop.f32.mrb[9].mxu0  ;;  %v1447_v30 = vadd.f32 %v1446_v29, %v2394_v3  ;;  %v1883_v31 = vpop.f32.mrb[6].mxu1 }
 0x329   : > { %v1340_v22 = vadd.f32 %v1339_v21, %v2376_v57  ;;  %v1341_v23 = vpop.f32.mrb[10].mxu0  ;;  %1513 = vst [vmem:[%s2594_s7 + $0xa0] sm:$0xff] %v1455_v28  ;;  %v1458_v32 = vadd.f32 %v1883_v31, %v2394_v3  ;;  %v1449_v33 = vpop.f32.mrb[7].mxu1 }
 0x32a   : > { %1505 = vst [vmem:[%s2594_s7 + $0x60] sm:$0xff] %v1338_v20  ;;  %v1342_v24 = vadd.f32 %v1341_v23, %v2374_v56  ;;  %v1343_v25 = vpop.f32.mrb[11].mxu0  ;;  %1507 = vst [vmem:[%s2594_s7 + $0x70] sm:$0xff] %v1447_v30  ;;  %v1450_v34 = vadd.f32 %v1449_v33, %v2394_v3 }
 0x32b   : > { %1506 = vst [vmem:[%s2594_s7 + $0x68] sm:$0xff] %v1340_v22  ;;  %v1344_v27 = vadd.f32 %v1343_v25, %v2376_v57  ;;  %1516 = vst [vmem:[%s2594_s7 + $0xb8] sm:$0xff] %v1458_v32 }
 0x32c   : > { %1508 = vst [vmem:[%s2594_s7 + $0x78] sm:$0xff] %v1342_v24  ;;  %1510 = vst [vmem:[%s2594_s7 + $0x88] sm:$0xff] %v1450_v34 }
 0x32d   : > { %1509 = vst [vmem:[%s2594_s7 + $0x80] sm:$0xff] %v1344_v27 }
 0x32e   : > { %v1886_v42 = vpop.f32.mrb[8].mxu1 }
 0x32f   : > { %v1347_v35 = vpop.f32.mrb[12].mxu0  ;;  %v1471_v44 = vadd.f32 %v1886_v42, %v2394_v3  ;;  %v1462_v45 = vpop.f32.mrb[9].mxu1 }
 0x330   : > { %v1348_v36 = vadd.f32 %v1347_v35, %v2374_v56  ;;  %v1349_v37 = vpop.f32.mrb[13].mxu0  ;;  %v1463_v46 = vadd.f32 %v1462_v45, %v2394_v3  ;;  %v1887_v47 = vpop.f32.mrb[10].mxu1 }
 0x331   : > { %v1350_v38 = vadd.f32 %v1349_v37, %v2376_v57  ;;  %v1351_v39 = vpop.f32.mrb[14].mxu0  ;;  %1525 = vst [vmem:[%s2594_s7 + $0x100] sm:$0xff] %v1471_v44  ;;  %v1474_v48 = vadd.f32 %v1887_v47, %v2394_v3  ;;  %v1465_v49 = vpop.f32.mrb[11].mxu1 }
 0x332   : > { %1511 = vst [vmem:[%s2594_s7 + $0x90] sm:$0xff] %v1348_v36  ;;  %v1352_v40 = vadd.f32 %v1351_v39, %v2374_v56  ;;  %v1353_v41 = vpop.f32.mrb[15].mxu0  ;;  %1519 = vst [vmem:[%s2594_s7 + $0xd0] sm:$0xff] %v1463_v46  ;;  %v1466_v50 = vadd.f32 %v1465_v49, %v2394_v3 }
 0x333   : > { %1512 = vst [vmem:[%s2594_s7 + $0x98] sm:$0xff] %v1350_v38  ;;  %v1354_v43 = vadd.f32 %v1353_v41, %v2376_v57  ;;  %1528 = vst [vmem:[%s2594_s7 + $0x118] sm:$0xff] %v1474_v48 }
 0x334   : > { %1514 = vst [vmem:[%s2594_s7 + $0xa8] sm:$0xff] %v1352_v40  ;;  %1522 = vst [vmem:[%s2594_s7 + $0xe8] sm:$0xff] %v1466_v50 }
 0x335   : > { %1515 = vst [vmem:[%s2594_s7 + $0xb0] sm:$0xff] %v1354_v43 }
 0x336   : > { %v1890_v61 = vpop.f32.mrb[12].mxu1 }
 0x337   : > { %v1357_v52 = vpop.f32.mrb[16].mxu0  ;;  %v1487_v62 = vadd.f32 %v1890_v61, %v2394_v3  ;;  %v1478_v63 = vpop.f32.mrb[13].mxu1 }
 0x338   : > { %v1358_v53 = vadd.f32 %v1357_v52, %v2374_v56  ;;  %v1359_v54 = vpop.f32.mrb[17].mxu0  ;;  %v1479_v0 = vadd.f32 %v1478_v63, %v2394_v3  ;;  %v1891_v1 = vpop.f32.mrb[14].mxu1 }
 0x339   : > { %v1360_v55 = vadd.f32 %v1359_v54, %v2376_v57  ;;  %v1361_v58 = vpop.f32.mrb[18].mxu0  ;;  %1537 = vst [vmem:[%s2594_s7 + $0x160] sm:$0xff] %v1487_v62  ;;  %v1490_v2 = vadd.f32 %v1891_v1, %v2394_v3  ;;  %v1481_v4 = vpop.f32.mrb[15].mxu1 }
 0x33a   : > { %1517 = vst [vmem:[%s2594_s7 + $0xc0] sm:$0xff] %v1358_v53  ;;  %v1362_v59 = vadd.f32 %v1361_v58, %v2374_v56  ;;  %v1363_v60 = vpop.f32.mrb[19].mxu0  ;;  %1531 = vst [vmem:[%s2594_s7 + $0x130] sm:$0xff] %v1479_v0  ;;  %v1482_v5 = vadd.f32 %v1481_v4, %v2394_v3 }
 0x33b   : > { %1518 = vst [vmem:[%s2594_s7 + $0xc8] sm:$0xff] %v1360_v55  ;;  %v1364_v51 = vadd.f32 %v1363_v60, %v2376_v57  ;;  %1540 = vst [vmem:[%s2594_s7 + $0x178] sm:$0xff] %v1490_v2 }
 0x33c   : > { %1520 = vst [vmem:[%s2594_s7 + $0xd8] sm:$0xff] %v1362_v59  ;;  %1534 = vst [vmem:[%s2594_s7 + $0x148] sm:$0xff] %v1482_v5 }
 0x33d   : > { %1521 = vst [vmem:[%s2594_s7 + $0xe0] sm:$0xff] %v1364_v51 }
 0x33f   : > { %v1367_v6 = vpop.f32.mrb[20].mxu0 }
 0x340   : > { %v1368_v7 = vadd.f32 %v1367_v6, %v2374_v56  ;;  %v1369_v8 = vpop.f32.mrb[21].mxu0 }
 0x341   : > { %v1370_v9 = vadd.f32 %v1369_v8, %v2376_v57  ;;  %v1371_v10 = vpop.f32.mrb[22].mxu0 }
 0x342   : > { %1523 = vst [vmem:[%s2594_s7 + $0xf0] sm:$0xff] %v1368_v7  ;;  %v1372_v3 = vadd.f32 %v1371_v10, %v2374_v56  ;;  %v1373_v11 = vpop.f32.mrb[23].mxu0 }
 0x343   : > { %1524 = vst [vmem:[%s2594_s7 + $0xf8] sm:$0xff] %v1370_v9  ;;  %v1374_v12 = vadd.f32 %v1373_v11, %v2376_v57 }
 0x344   : > { %1526 = vst [vmem:[%s2594_s7 + $0x108] sm:$0xff] %v1372_v3 }
 0x345   : > { %1527 = vst [vmem:[%s2594_s7 + $0x110] sm:$0xff] %v1374_v12 }
 0x347   : > { %v1377_v13 = vpop.f32.mrb[24].mxu0 }
 0x348   : > { %v1378_v14 = vadd.f32 %v1377_v13, %v2374_v56  ;;  %v1379_v15 = vpop.f32.mrb[25].mxu0 }
 0x349   : > { %v1380_v16 = vadd.f32 %v1379_v15, %v2376_v57  ;;  %v1381_v17 = vpop.f32.mrb[26].mxu0 }
 0x34a   : > { %1529 = vst [vmem:[%s2594_s7 + $0x120] sm:$0xff] %v1378_v14  ;;  %v1382_v18 = vadd.f32 %v1381_v17, %v2374_v56  ;;  %v1383_v19 = vpop.f32.mrb[27].mxu0 }
 0x34b   : > { %1530 = vst [vmem:[%s2594_s7 + $0x128] sm:$0xff] %v1380_v16  ;;  %v1384_v20 = vadd.f32 %v1383_v19, %v2376_v57 }
 0x34c   : > { %1532 = vst [vmem:[%s2594_s7 + $0x138] sm:$0xff] %v1382_v18 }
 0x34d   : > { %1533 = vst [vmem:[%s2594_s7 + $0x140] sm:$0xff] %v1384_v20 }
 0x34f   : > { %v1387_v21 = vpop.f32.mrb[28].mxu0 }
 0x350   : > { %v1388_v22 = vadd.f32 %v1387_v21, %v2374_v56  ;;  %v1389_v23 = vpop.f32.mrb[29].mxu0 }
 0x351   : > { %v1390_v24 = vadd.f32 %v1389_v23, %v2376_v57  ;;  %v1391_v25 = vpop.f32.mrb[30].mxu0 }
 0x352   : > { %1535 = vst [vmem:[%s2594_s7 + $0x150] sm:$0xff] %v1388_v22  ;;  %v1392_v26 = vadd.f32 %v1391_v25, %v2374_v56  ;;  %v1393_v27 = vpop.f32.mrb[31].mxu0 }
 0x353   : > { %1536 = vst [vmem:[%s2594_s7 + $0x158] sm:$0xff] %v1390_v24  ;;  %v1394_v28 = vadd.f32 %v1393_v27, %v2376_v57 }
 0x354   : > { %1538 = vst [vmem:[%s2594_s7 + $0x168] sm:$0xff] %v1392_v26 }
 0x355   : > { %1539 = vst [vmem:[%s2594_s7 + $0x170] sm:$0xff] %v1394_v28 }
 0x356 PF: > { %s17_s28 = sadd.s32 1, %s2091_s28   ;;  %s2595_s24 = smov %s2079_s25 }
 0x357   : > { %p14_p12 = scmp.ge.s32.totalorder %s17_s28, 5   ;;  %s2596_s25 = smov %s2169_s9 }
 0x358   : > { %s2597_s26 = smov %s2087_s27  ;;  %s2598_s27 = smov %s2600_s29 }
 0x359   :  { %16 = sbr.rel (!%p14_p12) target bundleno = 3 (0x3), region = 135 }

</bundles_post_ra>
